<compile_context>
chip_gen: v7x
topology: tpu7x:2x2x1
jax: 0.10.0
libtpu: 0.0.40
codegen_flags: <defaults>
</compile_context>

<pallas_src>
import functools
import math

import jax
import jax.numpy as jnp
from jax import lax
from jax.experimental import pallas as pl
from jax.experimental.pallas import tpu as pltpu

HIDDEN = 32          # config.hidden_size (demo size)
NUM_HEADS = 2        # num_attention_heads (demo size)
EPS = 1e-12          # BERT layer_norm_eps
DROPOUT_P = 0.1      # megatron attention_dropout default (used for both dropouts)


def _bert_attention_kernel(seed_ref,                                     # scalar prefetch (SMEM)
                           x_ref, maskb_ref,
                           wq_ref, bq_ref, wk_ref, bk_ref, wv_ref, bv_ref,
                           wo_ref, bo_ref, g_ref, beta_ref,
                           o_ref,
                           *, num_heads, attn_dropout_p, hidden_dropout_p, eps):
    S = x_ref.shape[1]
    H = o_ref.shape[2]
    dh = H // num_heads

    # ---- counter-based RNG (pure integer VPU ops, 2 mix rounds; lowers on TPU & interpret) ----
    pid = lax.convert_element_type(pl.program_id(0), jnp.uint32)
    base = lax.convert_element_type(seed_ref[0], jnp.uint32) ^ (pid * jnp.uint32(0x9E3779B9))

    def _rand_bits_2d(rows, cols, salt):
        r = lax.broadcasted_iota(jnp.int32, (rows, cols), 0).astype(jnp.uint32)
        c = lax.broadcasted_iota(jnp.int32, (rows, cols), 1).astype(jnp.uint32)
        h = (base + jnp.uint32(salt) * jnp.uint32(0x9E3779B1)) \
            ^ (r * jnp.uint32(0x85EBCA6B)) ^ (c * jnp.uint32(0xC2B2AE35))
        h = h ^ (h >> 15)
        h = h * jnp.uint32(0x7FEB352D)
        h = h ^ (h >> 16)
        return h

    def _thr(p):
        # keep iff raw bits >= p * 2^32  (uint32 threshold compare; no float convert)
        return jnp.uint32(min(int(p * 4294967296.0), 0xFFFFFFFF))

    x_in = x_ref[0]                                   # [S, H] (bf16 shipped from wrapper)
    x_f32 = x_in.astype(jnp.float32)                  # residual, f32
    x_bf = x_in.astype(jnp.bfloat16)

    # ---- QKV projections: bf16 into the MXU, f32 accumulate (1/sqrt(dh) folded into Wq/bq) ----
    q = jnp.dot(x_bf, wq_ref[...], preferred_element_type=jnp.float32) + bq_ref[...]   # [S, H]
    k = jnp.dot(x_bf, wk_ref[...], preferred_element_type=jnp.float32) + bk_ref[...]
    v = jnp.dot(x_bf, wv_ref[...], preferred_element_type=jnp.float32) + bv_ref[...]

    def _heads(t):            # [S, H] f32 -> head-major [num_heads, S, dh] bf16
        return jnp.transpose(t.reshape(S, num_heads, dh), (1, 0, 2)).astype(jnp.bfloat16)

    qh, kh, vh = _heads(q), _heads(k), _heads(v)

    # ---- batched attention over all heads at once --------------------------------------------
    s = jnp.einsum('nsd,ntd->nst', qh, kh, preferred_element_type=jnp.float32)          # [n,S,S]
    s = s + maskb_ref[...]                            # additive padding mask, [1,1,S] broadcast
    e = jnp.exp(s - jnp.max(s, axis=-1, keepdims=True))
    denom = jnp.sum(e, axis=-1, keepdims=True)        # [n, S, 1]

    inv_denom = pl.reciprocal(denom, approx=True)     # EUP slot instead of VALU divide
    if attn_dropout_p > 0.0:
        bits = _rand_bits_2d(num_heads * S, S, 0x243F6A).reshape(num_heads, S, S)
        e = jnp.where(bits >= _thr(attn_dropout_p), e, jnp.float32(0.0))
        # dropout rescale folded into the per-row scale (O(n*S), not O(n*S*S))
        inv_denom = inv_denom * jnp.float32(1.0 / (1.0 - attn_dropout_p))

    ctx = jnp.einsum('nst,ntd->nsd', e.astype(jnp.bfloat16), vh,
                     preferred_element_type=jnp.float32)                                # [n,S,dh]
    ctx = ctx * inv_denom                             # softmax norm + dropout rescale

    # ---- fused context -> output projection (batched over heads, then reduce) ----------------
    y = jnp.einsum('nsd,ndo->nso', ctx.astype(jnp.bfloat16), wo_ref[...],
                   preferred_element_type=jnp.float32)
    y = jnp.sum(y, axis=0) + bo_ref[...]              # [S, H], bias from skip_bias_add

    # ---- hidden-states dropout + residual + LayerNorm -----------------------------------------
    if hidden_dropout_p > 0.0:
        bits = _rand_bits_2d(S, H, 0x2545F4)
        y = jnp.where(bits >= _thr(hidden_dropout_p),
                      y * jnp.float32(1.0 / (1.0 - hidden_dropout_p)), jnp.float32(0.0))
    y = y + x_f32
    mu = jnp.mean(y, axis=-1, keepdims=True)
    var = jnp.mean(jnp.square(y - mu), axis=-1, keepdims=True)
    o_ref[0] = ((y - mu) * lax.rsqrt(var + jnp.float32(eps)) * g_ref[...]
                + beta_ref[...]).astype(o_ref.dtype)


def _vmem_limit_bytes():
    # Chip-aware scoped VMEM: v5e/v6e have 128 MiB physical, v7x only 64 MiB.
    try:
        kind = jax.devices()[0].device_kind.lower()
    except Exception:
        kind = ""
    if "v5" in kind or "v6" in kind:
        return 100 * 1024 * 1024
    return 48 * 1024 * 1024


def bert_attention_tp(x, attention_mask, wqkv, bqkv, wo, bo, gamma, beta, seed,
                      *, num_heads=NUM_HEADS, attn_dropout_p=DROPOUT_P,
                      hidden_dropout_p=DROPOUT_P, eps=EPS, training=True,
                      ship_bf16_activations=True):
    """x: [B, S, H] f32; attention_mask: [B, S] (1 = attend, 0 = padded). Returns [B, S, H]."""
    B, S, H = x.shape
    assert H % num_heads == 0
    dh = H // num_heads
    if not training:                       # PyTorch eval(): dropouts become no-ops (compiled out)
        attn_dropout_p = 0.0
        hidden_dropout_p = 0.0

    # additive padding-mask bias (Megatron attention_mask_func: masked_fill -> -10000)
    mask_bias = ((1.0 - attention_mask.astype(jnp.float32))
                 * jnp.float32(-10000.0)).reshape(B, 1, S)

    # Split fused QKV, fold 1/sqrt(dh) into the Q projection (zero in-kernel cost).
    # Weights ship as bf16 (MXU-native, half the HBM->VMEM traffic); biases / LN params stay f32.
    scale = 1.0 / math.sqrt(dh)
    wq = (wqkv[:, 0 * H:1 * H] * scale).astype(jnp.bfloat16)
    wk = wqkv[:, 1 * H:2 * H].astype(jnp.bfloat16)
    wv = wqkv[:, 2 * H:3 * H].astype(jnp.bfloat16)
    bq = (bqkv[0 * H:1 * H] * scale).reshape(1, H).astype(jnp.float32)
    bk = bqkv[1 * H:2 * H].reshape(1, H).astype(jnp.float32)
    bv = bqkv[2 * H:3 * H].reshape(1, H).astype(jnp.float32)
    wo_r = wo.reshape(num_heads, dh, H).astype(jnp.bfloat16)     # head-major output projection
    bo2 = bo.reshape(1, H).astype(jnp.float32)
    g2 = gamma.reshape(1, H).astype(jnp.float32)
    be2 = beta.reshape(1, H).astype(jnp.float32)
    seed_arr = jnp.asarray([seed], dtype=jnp.int32)

    # bf16 activation slab in/out of HBM (dominant traffic once weights are resident);
    # residual / softmax / dropout / LN math stays f32 inside the kernel (~1e-2 level delta).
    x_in = x.astype(jnp.bfloat16) if ship_bf16_activations else x

    kernel = functools.partial(
        _bert_attention_kernel, num_heads=num_heads,
        attn_dropout_p=attn_dropout_p, hidden_dropout_p=hidden_dropout_p, eps=eps)

    flops = int(B * (8 * S * H * H + 4 * S * S * H))
    transcendentals = int(B * (num_heads * S * S + num_heads * S + S))
    bytes_accessed = int(x_in.size * x_in.dtype.itemsize          # activations in
                         + B * S * H * x.dtype.itemsize           # output writeback
                         + (wq.size + wk.size + wv.size + wo_r.size) * 2
                         + (bq.size + bk.size + bv.size + bo2.size + g2.size + be2.size
                            + mask_bias.size) * 4)

    def _build(use_buffered):
        def _const(shape):
            zeros = (0,) * len(shape)
            if use_buffered:
                # index_map never changes -> single-buffer the resident weights (halves their VMEM)
                return pl.BlockSpec(shape, lambda b, seed, _z=zeros: _z,
                                    pipeline_mode=pl.Buffered(1))
            return pl.BlockSpec(shape, lambda b, seed, _z=zeros: _z)

        grid_spec = pltpu.PrefetchScalarGridSpec(
            num_scalar_prefetch=1,
            grid=(B,),   # one independent step per batch element
            in_specs=[
                pl.BlockSpec((1, S, H), lambda b, seed: (b, 0, 0)),     # x slab
                pl.BlockSpec((1, 1, S), lambda b, seed: (b, 0, 0)),     # additive mask
                _const((H, H)), _const((1, H)),                         # Wq (scaled), bq (scaled)
                _const((H, H)), _const((1, H)),                         # Wk, bk
                _const((H, H)), _const((1, H)),                         # Wv, bv
                _const((num_heads, dh, H)), _const((1, H)),             # Wo (head-major), bo
                _const((1, H)), _const((1, H)),                         # LN gamma, beta
            ],
            out_specs=pl.BlockSpec((1, S, H), lambda b, seed: (b, 0, 0)),
        )
        return pl.pallas_call(
            kernel,
            out_shape=jax.ShapeDtypeStruct((B, S, H), x.dtype),
            grid_spec=grid_spec,
            compiler_params=pltpu.CompilerParams(
                dimension_semantics=("parallel",),            # megacore-shard batch on v7x
                vmem_limit_bytes=_vmem_limit_bytes()),
            cost_estimate=pl.CostEstimate(flops=flops, transcendentals=transcendentals,
                                          bytes_accessed=bytes_accessed),
        )

    args = (seed_arr, x_in, mask_bias, wq, bq, wk, bk, wv, bv, wo_r, bo2, g2, be2)
    try:
        return _build(use_buffered=True)(*args)
    except Exception:
        # pipeline_mode=pl.Buffered(1) unsupported in this jax build -> default double-buffering
        return _build(use_buffered=False)(*args)


if __name__ == "__main__":
    B, S, H, NH = 2, 8, HIDDEN, NUM_HEADS

    key = jax.random.PRNGKey(0)
    kx, kq, kb1, ko, kb2 = jax.random.split(key, 5)

    # deterministic synthetic parameters (shapes from ParallelAttention + nn.LayerNorm)
    x = jax.random.normal(kx, (B, S, H), dtype=jnp.float32)
    wqkv = jax.random.normal(kq, (H, 3 * H), dtype=jnp.float32) * 0.02   # fused QKV weight
    bqkv = jax.random.normal(kb1, (3 * H,), dtype=jnp.float32) * 0.02    # fused QKV bias
    wo = jax.random.normal(ko, (H, H), dtype=jnp.float32) * 0.02         # output proj weight
    bo = jax.random.normal(kb2, (H,), dtype=jnp.float32) * 0.02          # output proj bias
    gamma = jnp.ones((H,), dtype=jnp.float32)                            # LayerNorm weight
    beta = jnp.zeros((H,), dtype=jnp.float32)                            # LayerNorm bias
    # padding mask: 1 = attend, 0 = padded (last two keys of batch 1 are padding)
    attention_mask = jnp.ones((B, S), dtype=jnp.int32).at[1, S - 2:].set(0)

    out = bert_attention_tp(x, attention_mask, wqkv, bqkv, wo, bo, gamma, beta, seed=1234,
                            num_heads=NH, attn_dropout_p=DROPOUT_P,
                            hidden_dropout_p=DROPOUT_P, eps=EPS, training=True)
    jax.block_until_ready(out)
    assert out.shape == (B, S, H)
    assert bool(jnp.all(jnp.isfinite(out)))
    print("KERNEL_OK")
</pallas_src>

<mosaic_0001>
module attributes {stable_mosaic.version = 11 : i64} {
  func.func @_bert_attention_kernel(%arg0: i32, %arg1: memref<1xi32, #tpu.memory_space<smem>>, %arg2: memref<1x8x32xbf16, #tpu.memory_space<vmem>>, %arg3: memref<1x1x8xf32, #tpu.memory_space<vmem>>, %arg4: memref<32x32xbf16, #tpu.memory_space<vmem>>, %arg5: memref<1x32xf32, #tpu.memory_space<vmem>>, %arg6: memref<32x32xbf16, #tpu.memory_space<vmem>>, %arg7: memref<1x32xf32, #tpu.memory_space<vmem>>, %arg8: memref<32x32xbf16, #tpu.memory_space<vmem>>, %arg9: memref<1x32xf32, #tpu.memory_space<vmem>>, %arg10: memref<2x16x32xbf16, #tpu.memory_space<vmem>>, %arg11: memref<1x32xf32, #tpu.memory_space<vmem>>, %arg12: memref<1x32xf32, #tpu.memory_space<vmem>>, %arg13: memref<1x32xf32, #tpu.memory_space<vmem>>, %arg14: memref<1x8x32xf32, #tpu.memory_space<vmem>>) attributes {dimension_semantics = [#tpu.dimension_semantics<parallel>], iteration_bounds = array<i64: 2>, scalar_prefetch = 1 : i64, scratch_operands = 0 : i64, tpu.core_type = #tpu.core_type<tc>, window_params = [{transform_indices = @transform_0, window_bounds = array<i64: 1, 8, 32>}, {transform_indices = @transform_1, window_bounds = array<i64: 1, 1, 8>}, {pipeline_mode = #tpu.pipeline_mode<synchronous>, transform_indices = @transform_2, window_bounds = array<i64: 32, 32>}, {pipeline_mode = #tpu.pipeline_mode<synchronous>, transform_indices = @transform_3, window_bounds = array<i64: 1, 32>}, {pipeline_mode = #tpu.pipeline_mode<synchronous>, transform_indices = @transform_4, window_bounds = array<i64: 32, 32>}, {pipeline_mode = #tpu.pipeline_mode<synchronous>, transform_indices = @transform_5, window_bounds = array<i64: 1, 32>}, {pipeline_mode = #tpu.pipeline_mode<synchronous>, transform_indices = @transform_6, window_bounds = array<i64: 32, 32>}, {pipeline_mode = #tpu.pipeline_mode<synchronous>, transform_indices = @transform_7, window_bounds = array<i64: 1, 32>}, {pipeline_mode = #tpu.pipeline_mode<synchronous>, transform_indices = @transform_8, window_bounds = array<i64: 2, 16, 32>}, {pipeline_mode = #tpu.pipeline_mode<synchronous>, transform_indices = @transform_9, window_bounds = array<i64: 1, 32>}, {pipeline_mode = #tpu.pipeline_mode<synchronous>, transform_indices = @transform_10, window_bounds = array<i64: 1, 32>}, {pipeline_mode = #tpu.pipeline_mode<synchronous>, transform_indices = @transform_11, window_bounds = array<i64: 1, 32>}, {transform_indices = @transform_12, window_bounds = array<i64: 1, 8, 32>}]} {
    %c0 = arith.constant 0 : index
    %0 = memref.load %arg1[%c0] : memref<1xi32, #tpu.memory_space<smem>>
    %c-1640531527_i32 = arith.constant -1640531527 : i32
    %1 = arith.muli %arg0, %c-1640531527_i32 : i32
    %2 = arith.xori %0, %1 : i32
    %c0_0 = arith.constant 0 : index
    %c0_1 = arith.constant 0 : index
    %c0_2 = arith.constant 0 : index
    %3 = vector.load %arg2[%c0_0, %c0_1, %c0_2] : memref<1x8x32xbf16, #tpu.memory_space<vmem>>, vector<1x8x32xbf16>
    %4 = vector.shape_cast %3 : vector<1x8x32xbf16> to vector<8x32xbf16>
    %5 = arith.extf %4 : vector<8x32xbf16> to vector<8x32xf32>
    %c0_3 = arith.constant 0 : index
    %c0_4 = arith.constant 0 : index
    %6 = vector.load %arg4[%c0_3, %c0_4] : memref<32x32xbf16, #tpu.memory_space<vmem>>, vector<32x32xbf16>
    %cst = arith.constant dense<0.000000e+00> : vector<8x32xf32>
    %7 = tpu.matmul %4, %6, %cst {dimension_numbers = #tpu.dot_dimension_numbers<[1], [0], [0], [1], [0, 0, 1, 1], [], []>} : vector<8x32xbf16>, vector<32x32xbf16>, vector<8x32xf32> -> vector<8x32xf32>
    %c0_5 = arith.constant 0 : index
    %c0_6 = arith.constant 0 : index
    %8 = vector.load %arg5[%c0_5, %c0_6] : memref<1x32xf32, #tpu.memory_space<vmem>>, vector<1x32xf32>
    %9 = vector.broadcast %8 : vector<1x32xf32> to vector<8x32xf32>
    %10 = arith.addf %7, %9 : vector<8x32xf32>
    %c0_7 = arith.constant 0 : index
    %c0_8 = arith.constant 0 : index
    %11 = vector.load %arg6[%c0_7, %c0_8] : memref<32x32xbf16, #tpu.memory_space<vmem>>, vector<32x32xbf16>
    %cst_9 = arith.constant dense<0.000000e+00> : vector<8x32xf32>
    %12 = tpu.matmul %4, %11, %cst_9 {dimension_numbers = #tpu.dot_dimension_numbers<[1], [0], [0], [1], [0, 0, 1, 1], [], []>} : vector<8x32xbf16>, vector<32x32xbf16>, vector<8x32xf32> -> vector<8x32xf32>
    %c0_10 = arith.constant 0 : index
    %c0_11 = arith.constant 0 : index
    %13 = vector.load %arg7[%c0_10, %c0_11] : memref<1x32xf32, #tpu.memory_space<vmem>>, vector<1x32xf32>
    %14 = vector.broadcast %13 : vector<1x32xf32> to vector<8x32xf32>
    %15 = arith.addf %12, %14 : vector<8x32xf32>
    %c0_12 = arith.constant 0 : index
    %c0_13 = arith.constant 0 : index
    %16 = vector.load %arg8[%c0_12, %c0_13] : memref<32x32xbf16, #tpu.memory_space<vmem>>, vector<32x32xbf16>
    %cst_14 = arith.constant dense<0.000000e+00> : vector<8x32xf32>
    %17 = tpu.matmul %4, %16, %cst_14 {dimension_numbers = #tpu.dot_dimension_numbers<[1], [0], [0], [1], [0, 0, 1, 1], [], []>} : vector<8x32xbf16>, vector<32x32xbf16>, vector<8x32xf32> -> vector<8x32xf32>
    %c0_15 = arith.constant 0 : index
    %c0_16 = arith.constant 0 : index
    %18 = vector.load %arg9[%c0_15, %c0_16] : memref<1x32xf32, #tpu.memory_space<vmem>>, vector<1x32xf32>
    %19 = vector.broadcast %18 : vector<1x32xf32> to vector<8x32xf32>
    %20 = arith.addf %17, %19 : vector<8x32xf32>
    %21 = vector.shape_cast %10 : vector<8x32xf32> to vector<8x2x16xf32>
    %22 = tpu.transpose %21, [1, 0, 2] : vector<8x2x16xf32> -> vector<2x8x16xf32>
    %23 = arith.truncf %22 : vector<2x8x16xf32> to vector<2x8x16xbf16>
    %24 = vector.shape_cast %15 : vector<8x32xf32> to vector<8x2x16xf32>
    %25 = tpu.transpose %24, [1, 0, 2] : vector<8x2x16xf32> -> vector<2x8x16xf32>
    %26 = arith.truncf %25 : vector<2x8x16xf32> to vector<2x8x16xbf16>
    %27 = vector.shape_cast %20 : vector<8x32xf32> to vector<8x2x16xf32>
    %28 = tpu.transpose %27, [1, 0, 2] : vector<8x2x16xf32> -> vector<2x8x16xf32>
    %29 = arith.truncf %28 : vector<2x8x16xf32> to vector<2x8x16xbf16>
    "tpu.trace_start"() <{level = 10 : i32, message = "nsd,ntd->nst"}> : () -> ()
    %cst_17 = arith.constant dense<0.000000e+00> : vector<2x8x8xf32>
    %30 = tpu.matmul %23, %26, %cst_17 {dimension_numbers = #tpu.dot_dimension_numbers<[2], [2], [1], [1], [0, 0, 0, 1, 1, 1], [0], [0]>} : vector<2x8x16xbf16>, vector<2x8x16xbf16>, vector<2x8x8xf32> -> vector<2x8x8xf32>
    "tpu.trace_stop"() : () -> ()
    %c0_18 = arith.constant 0 : index
    %c0_19 = arith.constant 0 : index
    %c0_20 = arith.constant 0 : index
    %31 = vector.load %arg3[%c0_18, %c0_19, %c0_20] : memref<1x1x8xf32, #tpu.memory_space<vmem>>, vector<1x1x8xf32>
    %32 = vector.broadcast %31 : vector<1x1x8xf32> to vector<2x8x8xf32>
    %33 = arith.addf %30, %32 : vector<2x8x8xf32>
    %cst_21 = arith.constant dense<0xFF800000> : vector<2x8xf32>
    %34 = vector.multi_reduction <maximumf>, %33, %cst_21 [2] : vector<2x8x8xf32> to vector<2x8xf32>
    %35 = vector.shape_cast %34 : vector<2x8xf32> to vector<2x8x1xf32>
    %36 = vector.broadcast %35 : vector<2x8x1xf32> to vector<2x8x8xf32>
    %37 = arith.subf %33, %36 : vector<2x8x8xf32>
    %38 = math.exp %37 : vector<2x8x8xf32>
    %cst_22 = arith.constant dense<0.000000e+00> : vector<2x8xf32>
    %39 = vector.multi_reduction <add>, %38, %cst_22 [2] : vector<2x8x8xf32> to vector<2x8xf32>
    %40 = vector.shape_cast %39 : vector<2x8xf32> to vector<2x8x1xf32>
    %41 = tpu.reciprocal %40 {approx = true} : vector<2x8x1xf32> -> vector<2x8x1xf32>
    %42 = tpu.iota {dimensions = array<i32: 0>} : vector<16x8xi32>
    %43 = tpu.iota {dimensions = array<i32: 1>} : vector<16x8xi32>
    %c2375530_i32 = arith.constant 2375530 : i32
    %c-1640531535_i32 = arith.constant -1640531535 : i32
    %44 = arith.muli %c2375530_i32, %c-1640531535_i32 : i32
    %45 = arith.addi %2, %44 : i32
    %c-2048144789_i32 = arith.constant -2048144789 : i32
    %46 = vector.broadcast %c-2048144789_i32 : i32 to vector<16x8xi32>
    %47 = arith.muli %42, %46 : vector<16x8xi32>
    %48 = vector.broadcast %45 : i32 to vector<16x8xi32>
    %49 = arith.xori %48, %47 : vector<16x8xi32>
    %c-1028477387_i32 = arith.constant -1028477387 : i32
    %50 = vector.broadcast %c-1028477387_i32 : i32 to vector<16x8xi32>
    %51 = arith.muli %43, %50 : vector<16x8xi32>
    %52 = arith.xori %49, %51 : vector<16x8xi32>
    %c15_i32 = arith.constant 15 : i32
    %53 = vector.broadcast %c15_i32 : i32 to vector<16x8xi32>
    %54 = arith.shrui %52, %53 : vector<16x8xi32>
    %55 = arith.xori %52, %54 : vector<16x8xi32>
    %c2146121005_i32 = arith.constant 2146121005 : i32
    %56 = vector.broadcast %c2146121005_i32 : i32 to vector<16x8xi32>
    %57 = arith.muli %55, %56 : vector<16x8xi32>
    %c16_i32 = arith.constant 16 : i32
    %58 = vector.broadcast %c16_i32 : i32 to vector<16x8xi32>
    %59 = arith.shrui %57, %58 : vector<16x8xi32>
    %60 = arith.xori %57, %59 : vector<16x8xi32>
    %61 = vector.shape_cast %60 : vector<16x8xi32> to vector<2x8x8xi32>
    %c429496729_i32 = arith.constant 429496729 : i32
    %62 = vector.broadcast %c429496729_i32 : i32 to vector<2x8x8xi32>
    %63 = arith.cmpi uge, %61, %62 : vector<2x8x8xi32>
    %cst_23 = arith.constant 0.000000e+00 : f32
    %64 = vector.broadcast %cst_23 : f32 to vector<2x8x8xf32>
    %65 = arith.select %63, %38, %64 : vector<2x8x8xi1>, vector<2x8x8xf32>
    %cst_24 = arith.constant 1.11111116 : f32
    %66 = vector.broadcast %cst_24 : f32 to vector<2x8x1xf32>
    %67 = arith.mulf %41, %66 : vector<2x8x1xf32>
    %68 = arith.truncf %65 : vector<2x8x8xf32> to vector<2x8x8xbf16>
    "tpu.trace_start"() <{level = 10 : i32, message = "nst,ntd->nsd"}> : () -> ()
    %cst_25 = arith.constant dense<0.000000e+00> : vector<2x8x16xf32>
    %69 = tpu.matmul %68, %29, %cst_25 {dimension_numbers = #tpu.dot_dimension_numbers<[2], [1], [1], [2], [0, 0, 0, 1, 1, 2], [0], [0]>} : vector<2x8x8xbf16>, vector<2x8x16xbf16>, vector<2x8x16xf32> -> vector<2x8x16xf32>
    "tpu.trace_stop"() : () -> ()
    %70 = vector.broadcast %67 : vector<2x8x1xf32> to vector<2x8x16xf32>
    %71 = arith.mulf %69, %70 : vector<2x8x16xf32>
    %72 = arith.truncf %71 : vector<2x8x16xf32> to vector<2x8x16xbf16>
    %c0_26 = arith.constant 0 : index
    %c0_27 = arith.constant 0 : index
    %c0_28 = arith.constant 0 : index
    %73 = vector.load %arg10[%c0_26, %c0_27, %c0_28] : memref<2x16x32xbf16, #tpu.memory_space<vmem>>, vector<2x16x32xbf16>
    "tpu.trace_start"() <{level = 10 : i32, message = "nsd,ndo->nso"}> : () -> ()
    %cst_29 = arith.constant dense<0.000000e+00> : vector<2x8x32xf32>
    %74 = tpu.matmul %72, %73, %cst_29 {dimension_numbers = #tpu.dot_dimension_numbers<[2], [1], [1], [2], [0, 0, 0, 1, 1, 2], [0], [0]>} : vector<2x8x16xbf16>, vector<2x16x32xbf16>, vector<2x8x32xf32> -> vector<2x8x32xf32>
    "tpu.trace_stop"() : () -> ()
    %cst_30 = arith.constant dense<0.000000e+00> : vector<8x32xf32>
    %75 = vector.multi_reduction <add>, %74, %cst_30 [0] : vector<2x8x32xf32> to vector<8x32xf32>
    %c0_31 = arith.constant 0 : index
    %c0_32 = arith.constant 0 : index
    %76 = vector.load %arg11[%c0_31, %c0_32] : memref<1x32xf32, #tpu.memory_space<vmem>>, vector<1x32xf32>
    %77 = vector.broadcast %76 : vector<1x32xf32> to vector<8x32xf32>
    %78 = arith.addf %75, %77 : vector<8x32xf32>
    %79 = tpu.iota {dimensions = array<i32: 0>} : vector<8x32xi32>
    %80 = tpu.iota {dimensions = array<i32: 1>} : vector<8x32xi32>
    %c2442740_i32 = arith.constant 2442740 : i32
    %c-1640531535_i32_33 = arith.constant -1640531535 : i32
    %81 = arith.muli %c2442740_i32, %c-1640531535_i32_33 : i32
    %82 = arith.addi %2, %81 : i32
    %c-2048144789_i32_34 = arith.constant -2048144789 : i32
    %83 = vector.broadcast %c-2048144789_i32_34 : i32 to vector<8x32xi32>
    %84 = arith.muli %79, %83 : vector<8x32xi32>
    %85 = vector.broadcast %82 : i32 to vector<8x32xi32>
    %86 = arith.xori %85, %84 : vector<8x32xi32>
    %c-1028477387_i32_35 = arith.constant -1028477387 : i32
    %87 = vector.broadcast %c-1028477387_i32_35 : i32 to vector<8x32xi32>
    %88 = arith.muli %80, %87 : vector<8x32xi32>
    %89 = arith.xori %86, %88 : vector<8x32xi32>
    %c15_i32_36 = arith.constant 15 : i32
    %90 = vector.broadcast %c15_i32_36 : i32 to vector<8x32xi32>
    %91 = arith.shrui %89, %90 : vector<8x32xi32>
    %92 = arith.xori %89, %91 : vector<8x32xi32>
    %c2146121005_i32_37 = arith.constant 2146121005 : i32
    %93 = vector.broadcast %c2146121005_i32_37 : i32 to vector<8x32xi32>
    %94 = arith.muli %92, %93 : vector<8x32xi32>
    %c16_i32_38 = arith.constant 16 : i32
    %95 = vector.broadcast %c16_i32_38 : i32 to vector<8x32xi32>
    %96 = arith.shrui %94, %95 : vector<8x32xi32>
    %97 = arith.xori %94, %96 : vector<8x32xi32>
    %c429496729_i32_39 = arith.constant 429496729 : i32
    %98 = vector.broadcast %c429496729_i32_39 : i32 to vector<8x32xi32>
    %99 = arith.cmpi uge, %97, %98 : vector<8x32xi32>
    %cst_40 = arith.constant 1.11111116 : f32
    %100 = vector.broadcast %cst_40 : f32 to vector<8x32xf32>
    %101 = arith.mulf %78, %100 : vector<8x32xf32>
    %cst_41 = arith.constant 0.000000e+00 : f32
    %102 = vector.broadcast %cst_41 : f32 to vector<8x32xf32>
    %103 = arith.select %99, %101, %102 : vector<8x32xi1>, vector<8x32xf32>
    %104 = arith.addf %103, %5 : vector<8x32xf32>
    %cst_42 = arith.constant dense<0.000000e+00> : vector<8xf32>
    %105 = vector.multi_reduction <add>, %104, %cst_42 [1] : vector<8x32xf32> to vector<8xf32>
    %106 = vector.shape_cast %105 : vector<8xf32> to vector<8x1xf32>
    %cst_43 = arith.constant 3.200000e+01 : f32
    %107 = vector.broadcast %cst_43 : f32 to vector<8x1xf32>
    %108 = arith.divf %106, %107 : vector<8x1xf32>
    %109 = vector.broadcast %108 : vector<8x1xf32> to vector<8x32xf32>
    %110 = arith.subf %104, %109 : vector<8x32xf32>
    %111 = arith.mulf %110, %110 : vector<8x32xf32>
    %cst_44 = arith.constant dense<0.000000e+00> : vector<8xf32>
    %112 = vector.multi_reduction <add>, %111, %cst_44 [1] : vector<8x32xf32> to vector<8xf32>
    %113 = vector.shape_cast %112 : vector<8xf32> to vector<8x1xf32>
    %cst_45 = arith.constant 3.200000e+01 : f32
    %114 = vector.broadcast %cst_45 : f32 to vector<8x1xf32>
    %115 = arith.divf %113, %114 : vector<8x1xf32>
    %116 = vector.broadcast %108 : vector<8x1xf32> to vector<8x32xf32>
    %117 = arith.subf %104, %116 : vector<8x32xf32>
    %cst_46 = arith.constant 9.99999996E-13 : f32
    %118 = vector.broadcast %cst_46 : f32 to vector<8x1xf32>
    %119 = arith.addf %115, %118 : vector<8x1xf32>
    %120 = math.rsqrt %119 : vector<8x1xf32>
    %121 = vector.broadcast %120 : vector<8x1xf32> to vector<8x32xf32>
    %122 = arith.mulf %117, %121 : vector<8x32xf32>
    %c0_47 = arith.constant 0 : index
    %c0_48 = arith.constant 0 : index
    %123 = vector.load %arg12[%c0_47, %c0_48] : memref<1x32xf32, #tpu.memory_space<vmem>>, vector<1x32xf32>
    %124 = vector.broadcast %123 : vector<1x32xf32> to vector<8x32xf32>
    %125 = arith.mulf %122, %124 : vector<8x32xf32>
    %c0_49 = arith.constant 0 : index
    %c0_50 = arith.constant 0 : index
    %126 = vector.load %arg13[%c0_49, %c0_50] : memref<1x32xf32, #tpu.memory_space<vmem>>, vector<1x32xf32>
    %127 = vector.broadcast %126 : vector<1x32xf32> to vector<8x32xf32>
    %128 = arith.addf %125, %127 : vector<8x32xf32>
    %c0_51 = arith.constant 0 : index
    %c0_52 = arith.constant 0 : index
    %c0_53 = arith.constant 0 : index
    %129 = vector.load %arg14[%c0_51, %c0_52, %c0_53] : memref<1x8x32xf32, #tpu.memory_space<vmem>>, vector<1x8x32xf32>
    %130 = vector.shape_cast %129 : vector<1x8x32xf32> to vector<8x32xf32>
    %131 = vector.shape_cast %128 : vector<8x32xf32> to vector<1x8x32xf32>
    tpu.vector_store %arg14[%c0_51, %c0_52, %c0_53], %131 {strides = array<i32>} : memref<1x8x32xf32, #tpu.memory_space<vmem>>, vector<1x8x32xf32>,
    return
  }
  func.func @transform_0(%arg0: i32, %arg1: memref<1xi32, #tpu.memory_space<smem>>) -> (i32, i32, i32) {
    %c0_i32 = arith.constant 0 : i32
    %c0_i32_0 = arith.constant 0 : i32
    %c0_i32_1 = arith.constant 0 : i32
    return %arg0, %c0_i32, %c0_i32_0 : i32, i32, i32
  }
  func.func @transform_1(%arg0: i32, %arg1: memref<1xi32, #tpu.memory_space<smem>>) -> (i32, i32, i32) {
    %c0_i32 = arith.constant 0 : i32
    %c0_i32_0 = arith.constant 0 : i32
    %c0_i32_1 = arith.constant 0 : i32
    return %arg0, %c0_i32, %c0_i32_0 : i32, i32, i32
  }
  func.func @transform_2(%arg0: i32, %arg1: memref<1xi32, #tpu.memory_space<smem>>) -> (i32, i32) {
    %c0_i32 = arith.constant 0 : i32
    %c0_i32_0 = arith.constant 0 : i32
    %c0_i32_1 = arith.constant 0 : i32
    return %c0_i32, %c0_i32_0 : i32, i32
  }
  func.func @transform_3(%arg0: i32, %arg1: memref<1xi32, #tpu.memory_space<smem>>) -> (i32, i32) {
    %c0_i32 = arith.constant 0 : i32
    %c0_i32_0 = arith.constant 0 : i32
    %c0_i32_1 = arith.constant 0 : i32
    return %c0_i32, %c0_i32_0 : i32, i32
  }
  func.func @transform_4(%arg0: i32, %arg1: memref<1xi32, #tpu.memory_space<smem>>) -> (i32, i32) {
    %c0_i32 = arith.constant 0 : i32
    %c0_i32_0 = arith.constant 0 : i32
    %c0_i32_1 = arith.constant 0 : i32
    return %c0_i32, %c0_i32_0 : i32, i32
  }
  func.func @transform_5(%arg0: i32, %arg1: memref<1xi32, #tpu.memory_space<smem>>) -> (i32, i32) {
    %c0_i32 = arith.constant 0 : i32
    %c0_i32_0 = arith.constant 0 : i32
    %c0_i32_1 = arith.constant 0 : i32
    return %c0_i32, %c0_i32_0 : i32, i32
  }
  func.func @transform_6(%arg0: i32, %arg1: memref<1xi32, #tpu.memory_space<smem>>) -> (i32, i32) {
    %c0_i32 = arith.constant 0 : i32
    %c0_i32_0 = arith.constant 0 : i32
    %c0_i32_1 = arith.constant 0 : i32
    return %c0_i32, %c0_i32_0 : i32, i32
  }
  func.func @transform_7(%arg0: i32, %arg1: memref<1xi32, #tpu.memory_space<smem>>) -> (i32, i32) {
    %c0_i32 = arith.constant 0 : i32
    %c0_i32_0 = arith.constant 0 : i32
    %c0_i32_1 = arith.constant 0 : i32
    return %c0_i32, %c0_i32_0 : i32, i32
  }
  func.func @transform_8(%arg0: i32, %arg1: memref<1xi32, #tpu.memory_space<smem>>) -> (i32, i32, i32) {
    %c0_i32 = arith.constant 0 : i32
    %c0_i32_0 = arith.constant 0 : i32
    %c0_i32_1 = arith.constant 0 : i32
    %c0_i32_2 = arith.constant 0 : i32
    return %c0_i32, %c0_i32_0, %c0_i32_1 : i32, i32, i32
  }
  func.func @transform_9(%arg0: i32, %arg1: memref<1xi32, #tpu.memory_space<smem>>) -> (i32, i32) {
    %c0_i32 = arith.constant 0 : i32
    %c0_i32_0 = arith.constant 0 : i32
    %c0_i32_1 = arith.constant 0 : i32
    return %c0_i32, %c0_i32_0 : i32, i32
  }
  func.func @transform_10(%arg0: i32, %arg1: memref<1xi32, #tpu.memory_space<smem>>) -> (i32, i32) {
    %c0_i32 = arith.constant 0 : i32
    %c0_i32_0 = arith.constant 0 : i32
    %c0_i32_1 = arith.constant 0 : i32
    return %c0_i32, %c0_i32_0 : i32, i32
  }
  func.func @transform_11(%arg0: i32, %arg1: memref<1xi32, #tpu.memory_space<smem>>) -> (i32, i32) {
    %c0_i32 = arith.constant 0 : i32
    %c0_i32_0 = arith.constant 0 : i32
    %c0_i32_1 = arith.constant 0 : i32
    return %c0_i32, %c0_i32_0 : i32, i32
  }
  func.func @transform_12(%arg0: i32, %arg1: memref<1xi32, #tpu.memory_space<smem>>) -> (i32, i32, i32) {
    %c0_i32 = arith.constant 0 : i32
    %c0_i32_0 = arith.constant 0 : i32
    %c0_i32_1 = arith.constant 0 : i32
    return %arg0, %c0_i32, %c0_i32_0 : i32, i32, i32
  }
}

module attributes {stable_mosaic.version = 11 : i64} {
  func.func @_bert_attention_kernel(%arg0: i32, %arg1: memref<1xi32, #tpu.memory_space<smem>>, %arg2: memref<1x8x32xbf16, #tpu.memory_space<vmem>>, %arg3: memref<1x1x8xf32, #tpu.memory_space<vmem>>, %arg4: memref<32x32xbf16, #tpu.memory_space<vmem>>, %arg5: memref<1x32xf32, #tpu.memory_space<vmem>>, %arg6: memref<32x32xbf16, #tpu.memory_space<vmem>>, %arg7: memref<1x32xf32, #tpu.memory_space<vmem>>, %arg8: memref<32x32xbf16, #tpu.memory_space<vmem>>, %arg9: memref<1x32xf32, #tpu.memory_space<vmem>>, %arg10: memref<2x16x32xbf16, #tpu.memory_space<vmem>>, %arg11: memref<1x32xf32, #tpu.memory_space<vmem>>, %arg12: memref<1x32xf32, #tpu.memory_space<vmem>>, %arg13: memref<1x32xf32, #tpu.memory_space<vmem>>, %arg14: memref<1x8x32xf32, #tpu.memory_space<vmem>>) attributes {dimension_semantics = [#tpu.dimension_semantics<parallel>], iteration_bounds = array<i64: 2>, scalar_prefetch = 1 : i64, scratch_operands = 0 : i64, tpu.core_type = #tpu.core_type<tc>, window_params = [{transform_indices = @transform_0, window_bounds = array<i64: 1, 8, 32>}, {transform_indices = @transform_1, window_bounds = array<i64: 1, 1, 8>}, {pipeline_mode = #tpu.pipeline_mode<synchronous>, transform_indices = @transform_2, window_bounds = array<i64: 32, 32>}, {pipeline_mode = #tpu.pipeline_mode<synchronous>, transform_indices = @transform_3, window_bounds = array<i64: 1, 32>}, {pipeline_mode = #tpu.pipeline_mode<synchronous>, transform_indices = @transform_4, window_bounds = array<i64: 32, 32>}, {pipeline_mode = #tpu.pipeline_mode<synchronous>, transform_indices = @transform_5, window_bounds = array<i64: 1, 32>}, {pipeline_mode = #tpu.pipeline_mode<synchronous>, transform_indices = @transform_6, window_bounds = array<i64: 32, 32>}, {pipeline_mode = #tpu.pipeline_mode<synchronous>, transform_indices = @transform_7, window_bounds = array<i64: 1, 32>}, {pipeline_mode = #tpu.pipeline_mode<synchronous>, transform_indices = @transform_8, window_bounds = array<i64: 2, 16, 32>}, {pipeline_mode = #tpu.pipeline_mode<synchronous>, transform_indices = @transform_9, window_bounds = array<i64: 1, 32>}, {pipeline_mode = #tpu.pipeline_mode<synchronous>, transform_indices = @transform_10, window_bounds = array<i64: 1, 32>}, {pipeline_mode = #tpu.pipeline_mode<synchronous>, transform_indices = @transform_11, window_bounds = array<i64: 1, 32>}, {transform_indices = @transform_12, window_bounds = array<i64: 1, 8, 32>}]} {
    %c0 = arith.constant 0 : index
    %0 = memref.load %arg1[%c0] : memref<1xi32, #tpu.memory_space<smem>>
    %c-1640531527_i32 = arith.constant -1640531527 : i32
    %1 = arith.muli %arg0, %c-1640531527_i32 : i32
    %2 = arith.xori %0, %1 : i32
    %c0_0 = arith.constant 0 : index
    %c0_1 = arith.constant 0 : index
    %c0_2 = arith.constant 0 : index
    %3 = vector.load %arg2[%c0_0, %c0_1, %c0_2] : memref<1x8x32xbf16, #tpu.memory_space<vmem>>, vector<1x8x32xbf16>
    %4 = vector.shape_cast %3 : vector<1x8x32xbf16> to vector<8x32xbf16>
    %5 = arith.extf %4 : vector<8x32xbf16> to vector<8x32xf32>
    %c0_3 = arith.constant 0 : index
    %c0_4 = arith.constant 0 : index
    %6 = vector.load %arg4[%c0_3, %c0_4] : memref<32x32xbf16, #tpu.memory_space<vmem>>, vector<32x32xbf16>
    %cst = arith.constant dense<0.000000e+00> : vector<8x32xf32>
    %7 = tpu.matmul %4, %6, %cst {dimension_numbers = #tpu.dot_dimension_numbers<[1], [0], [0], [1], [0, 0, 1, 1], [], []>} : vector<8x32xbf16>, vector<32x32xbf16>, vector<8x32xf32> -> vector<8x32xf32>
    %c0_5 = arith.constant 0 : index
    %c0_6 = arith.constant 0 : index
    %8 = vector.load %arg5[%c0_5, %c0_6] : memref<1x32xf32, #tpu.memory_space<vmem>>, vector<1x32xf32>
    %9 = vector.broadcast %8 : vector<1x32xf32> to vector<8x32xf32>
    %10 = arith.addf %7, %9 : vector<8x32xf32>
    %c0_7 = arith.constant 0 : index
    %c0_8 = arith.constant 0 : index
    %11 = vector.load %arg6[%c0_7, %c0_8] : memref<32x32xbf16, #tpu.memory_space<vmem>>, vector<32x32xbf16>
    %cst_9 = arith.constant dense<0.000000e+00> : vector<8x32xf32>
    %12 = tpu.matmul %4, %11, %cst_9 {dimension_numbers = #tpu.dot_dimension_numbers<[1], [0], [0], [1], [0, 0, 1, 1], [], []>} : vector<8x32xbf16>, vector<32x32xbf16>, vector<8x32xf32> -> vector<8x32xf32>
    %c0_10 = arith.constant 0 : index
    %c0_11 = arith.constant 0 : index
    %13 = vector.load %arg7[%c0_10, %c0_11] : memref<1x32xf32, #tpu.memory_space<vmem>>, vector<1x32xf32>
    %14 = vector.broadcast %13 : vector<1x32xf32> to vector<8x32xf32>
    %15 = arith.addf %12, %14 : vector<8x32xf32>
    %c0_12 = arith.constant 0 : index
    %c0_13 = arith.constant 0 : index
    %16 = vector.load %arg8[%c0_12, %c0_13] : memref<32x32xbf16, #tpu.memory_space<vmem>>, vector<32x32xbf16>
    %cst_14 = arith.constant dense<0.000000e+00> : vector<8x32xf32>
    %17 = tpu.matmul %4, %16, %cst_14 {dimension_numbers = #tpu.dot_dimension_numbers<[1], [0], [0], [1], [0, 0, 1, 1], [], []>} : vector<8x32xbf16>, vector<32x32xbf16>, vector<8x32xf32> -> vector<8x32xf32>
    %c0_15 = arith.constant 0 : index
    %c0_16 = arith.constant 0 : index
    %18 = vector.load %arg9[%c0_15, %c0_16] : memref<1x32xf32, #tpu.memory_space<vmem>>, vector<1x32xf32>
    %19 = vector.broadcast %18 : vector<1x32xf32> to vector<8x32xf32>
    %20 = arith.addf %17, %19 : vector<8x32xf32>
    %21 = vector.shape_cast %10 : vector<8x32xf32> to vector<8x2x16xf32>
    %22 = tpu.transpose %21, [1, 0, 2] : vector<8x2x16xf32> -> vector<2x8x16xf32>
    %23 = arith.truncf %22 : vector<2x8x16xf32> to vector<2x8x16xbf16>
    %24 = vector.shape_cast %15 : vector<8x32xf32> to vector<8x2x16xf32>
    %25 = tpu.transpose %24, [1, 0, 2] : vector<8x2x16xf32> -> vector<2x8x16xf32>
    %26 = arith.truncf %25 : vector<2x8x16xf32> to vector<2x8x16xbf16>
    %27 = vector.shape_cast %20 : vector<8x32xf32> to vector<8x2x16xf32>
    %28 = tpu.transpose %27, [1, 0, 2] : vector<8x2x16xf32> -> vector<2x8x16xf32>
    %29 = arith.truncf %28 : vector<2x8x16xf32> to vector<2x8x16xbf16>
    "tpu.trace_start"() <{level = 10 : i32, message = "nsd,ntd->nst"}> : () -> ()
    %cst_17 = arith.constant dense<0.000000e+00> : vector<2x8x8xf32>
    %30 = tpu.matmul %23, %26, %cst_17 {dimension_numbers = #tpu.dot_dimension_numbers<[2], [2], [1], [1], [0, 0, 0, 1, 1, 1], [0], [0]>} : vector<2x8x16xbf16>, vector<2x8x16xbf16>, vector<2x8x8xf32> -> vector<2x8x8xf32>
    "tpu.trace_stop"() : () -> ()
    %c0_18 = arith.constant 0 : index
    %c0_19 = arith.constant 0 : index
    %c0_20 = arith.constant 0 : index
    %31 = vector.load %arg3[%c0_18, %c0_19, %c0_20] : memref<1x1x8xf32, #tpu.memory_space<vmem>>, vector<1x1x8xf32>
    %32 = vector.broadcast %31 : vector<1x1x8xf32> to vector<2x8x8xf32>
    %33 = arith.addf %30, %32 : vector<2x8x8xf32>
    %cst_21 = arith.constant dense<0xFF800000> : vector<2x8xf32>
    %34 = vector.multi_reduction <maximumf>, %33, %cst_21 [2] : vector<2x8x8xf32> to vector<2x8xf32>
    %35 = vector.shape_cast %34 : vector<2x8xf32> to vector<2x8x1xf32>
    %36 = vector.broadcast %35 : vector<2x8x1xf32> to vector<2x8x8xf32>
    %37 = arith.subf %33, %36 : vector<2x8x8xf32>
    %38 = math.exp %37 : vector<2x8x8xf32>
    %cst_22 = arith.constant dense<0.000000e+00> : vector<2x8xf32>
    %39 = vector.multi_reduction <add>, %38, %cst_22 [2] : vector<2x8x8xf32> to vector<2x8xf32>
    %40 = vector.shape_cast %39 : vector<2x8xf32> to vector<2x8x1xf32>
    %41 = tpu.reciprocal %40 {approx = true} : vector<2x8x1xf32> -> vector<2x8x1xf32>
    %42 = tpu.iota {dimensions = array<i32: 0>} : vector<16x8xi32>
    %43 = tpu.iota {dimensions = array<i32: 1>} : vector<16x8xi32>
    %c2375530_i32 = arith.constant 2375530 : i32
    %c-1640531535_i32 = arith.constant -1640531535 : i32
    %44 = arith.muli %c2375530_i32, %c-1640531535_i32 : i32
    %45 = arith.addi %2, %44 : i32
    %c-2048144789_i32 = arith.constant -2048144789 : i32
    %46 = vector.broadcast %c-2048144789_i32 : i32 to vector<16x8xi32>
    %47 = arith.muli %42, %46 : vector<16x8xi32>
    %48 = vector.broadcast %45 : i32 to vector<16x8xi32>
    %49 = arith.xori %48, %47 : vector<16x8xi32>
    %c-1028477387_i32 = arith.constant -1028477387 : i32
    %50 = vector.broadcast %c-1028477387_i32 : i32 to vector<16x8xi32>
    %51 = arith.muli %43, %50 : vector<16x8xi32>
    %52 = arith.xori %49, %51 : vector<16x8xi32>
    %c15_i32 = arith.constant 15 : i32
    %53 = vector.broadcast %c15_i32 : i32 to vector<16x8xi32>
    %54 = arith.shrui %52, %53 : vector<16x8xi32>
    %55 = arith.xori %52, %54 : vector<16x8xi32>
    %c2146121005_i32 = arith.constant 2146121005 : i32
    %56 = vector.broadcast %c2146121005_i32 : i32 to vector<16x8xi32>
    %57 = arith.muli %55, %56 : vector<16x8xi32>
    %c16_i32 = arith.constant 16 : i32
    %58 = vector.broadcast %c16_i32 : i32 to vector<16x8xi32>
    %59 = arith.shrui %57, %58 : vector<16x8xi32>
    %60 = arith.xori %57, %59 : vector<16x8xi32>
    %61 = vector.shape_cast %60 : vector<16x8xi32> to vector<2x8x8xi32>
    %c429496729_i32 = arith.constant 429496729 : i32
    %62 = vector.broadcast %c429496729_i32 : i32 to vector<2x8x8xi32>
    %63 = arith.cmpi uge, %61, %62 : vector<2x8x8xi32>
    %cst_23 = arith.constant 0.000000e+00 : f32
    %64 = vector.broadcast %cst_23 : f32 to vector<2x8x8xf32>
    %65 = arith.select %63, %38, %64 : vector<2x8x8xi1>, vector<2x8x8xf32>
    %cst_24 = arith.constant 1.11111116 : f32
    %66 = vector.broadcast %cst_24 : f32 to vector<2x8x1xf32>
    %67 = arith.mulf %41, %66 : vector<2x8x1xf32>
    %68 = arith.truncf %65 : vector<2x8x8xf32> to vector<2x8x8xbf16>
    "tpu.trace_start"() <{level = 10 : i32, message = "nst,ntd->nsd"}> : () -> ()
    %cst_25 = arith.constant dense<0.000000e+00> : vector<2x8x16xf32>
    %69 = tpu.matmul %68, %29, %cst_25 {dimension_numbers = #tpu.dot_dimension_numbers<[2], [1], [1], [2], [0, 0, 0, 1, 1, 2], [0], [0]>} : vector<2x8x8xbf16>, vector<2x8x16xbf16>, vector<2x8x16xf32> -> vector<2x8x16xf32>
    "tpu.trace_stop"() : () -> ()
    %70 = vector.broadcast %67 : vector<2x8x1xf32> to vector<2x8x16xf32>
    %71 = arith.mulf %69, %70 : vector<2x8x16xf32>
    %72 = arith.truncf %71 : vector<2x8x16xf32> to vector<2x8x16xbf16>
    %c0_26 = arith.constant 0 : index
    %c0_27 = arith.constant 0 : index
    %c0_28 = arith.constant 0 : index
    %73 = vector.load %arg10[%c0_26, %c0_27, %c0_28] : memref<2x16x32xbf16, #tpu.memory_space<vmem>>, vector<2x16x32xbf16>
    "tpu.trace_start"() <{level = 10 : i32, message = "nsd,ndo->nso"}> : () -> ()
    %cst_29 = arith.constant dense<0.000000e+00> : vector<2x8x32xf32>
    %74 = tpu.matmul %72, %73, %cst_29 {dimension_numbers = #tpu.dot_dimension_numbers<[2], [1], [1], [2], [0, 0, 0, 1, 1, 2], [0], [0]>} : vector<2x8x16xbf16>, vector<2x16x32xbf16>, vector<2x8x32xf32> -> vector<2x8x32xf32>
    "tpu.trace_stop"() : () -> ()
    %cst_30 = arith.constant dense<0.000000e+00> : vector<8x32xf32>
    %75 = vector.multi_reduction <add>, %74, %cst_30 [0] : vector<2x8x32xf32> to vector<8x32xf32>
    %c0_31 = arith.constant 0 : index
    %c0_32 = arith.constant 0 : index
    %76 = vector.load %arg11[%c0_31, %c0_32] : memref<1x32xf32, #tpu.memory_space<vmem>>, vector<1x32xf32>
    %77 = vector.broadcast %76 : vector<1x32xf32> to vector<8x32xf32>
    %78 = arith.addf %75, %77 : vector<8x32xf32>
    %79 = tpu.iota {dimensions = array<i32: 0>} : vector<8x32xi32>
    %80 = tpu.iota {dimensions = array<i32: 1>} : vector<8x32xi32>
    %c2442740_i32 = arith.constant 2442740 : i32
    %c-1640531535_i32_33 = arith.constant -1640531535 : i32
    %81 = arith.muli %c2442740_i32, %c-1640531535_i32_33 : i32
    %82 = arith.addi %2, %81 : i32
    %c-2048144789_i32_34 = arith.constant -2048144789 : i32
    %83 = vector.broadcast %c-2048144789_i32_34 : i32 to vector<8x32xi32>
    %84 = arith.muli %79, %83 : vector<8x32xi32>
    %85 = vector.broadcast %82 : i32 to vector<8x32xi32>
    %86 = arith.xori %85, %84 : vector<8x32xi32>
    %c-1028477387_i32_35 = arith.constant -1028477387 : i32
    %87 = vector.broadcast %c-1028477387_i32_35 : i32 to vector<8x32xi32>
    %88 = arith.muli %80, %87 : vector<8x32xi32>
    %89 = arith.xori %86, %88 : vector<8x32xi32>
    %c15_i32_36 = arith.constant 15 : i32
    %90 = vector.broadcast %c15_i32_36 : i32 to vector<8x32xi32>
    %91 = arith.shrui %89, %90 : vector<8x32xi32>
    %92 = arith.xori %89, %91 : vector<8x32xi32>
    %c2146121005_i32_37 = arith.constant 2146121005 : i32
    %93 = vector.broadcast %c2146121005_i32_37 : i32 to vector<8x32xi32>
    %94 = arith.muli %92, %93 : vector<8x32xi32>
    %c16_i32_38 = arith.constant 16 : i32
    %95 = vector.broadcast %c16_i32_38 : i32 to vector<8x32xi32>
    %96 = arith.shrui %94, %95 : vector<8x32xi32>
    %97 = arith.xori %94, %96 : vector<8x32xi32>
    %c429496729_i32_39 = arith.constant 429496729 : i32
    %98 = vector.broadcast %c429496729_i32_39 : i32 to vector<8x32xi32>
    %99 = arith.cmpi uge, %97, %98 : vector<8x32xi32>
    %cst_40 = arith.constant 1.11111116 : f32
    %100 = vector.broadcast %cst_40 : f32 to vector<8x32xf32>
    %101 = arith.mulf %78, %100 : vector<8x32xf32>
    %cst_41 = arith.constant 0.000000e+00 : f32
    %102 = vector.broadcast %cst_41 : f32 to vector<8x32xf32>
    %103 = arith.select %99, %101, %102 : vector<8x32xi1>, vector<8x32xf32>
    %104 = arith.addf %103, %5 : vector<8x32xf32>
    %cst_42 = arith.constant dense<0.000000e+00> : vector<8xf32>
    %105 = vector.multi_reduction <add>, %104, %cst_42 [1] : vector<8x32xf32> to vector<8xf32>
    %106 = vector.shape_cast %105 : vector<8xf32> to vector<8x1xf32>
    %cst_43 = arith.constant 3.200000e+01 : f32
    %107 = vector.broadcast %cst_43 : f32 to vector<8x1xf32>
    %108 = arith.divf %106, %107 : vector<8x1xf32>
    %109 = vector.broadcast %108 : vector<8x1xf32> to vector<8x32xf32>
    %110 = arith.subf %104, %109 : vector<8x32xf32>
    %111 = arith.mulf %110, %110 : vector<8x32xf32>
    %cst_44 = arith.constant dense<0.000000e+00> : vector<8xf32>
    %112 = vector.multi_reduction <add>, %111, %cst_44 [1] : vector<8x32xf32> to vector<8xf32>
    %113 = vector.shape_cast %112 : vector<8xf32> to vector<8x1xf32>
    %cst_45 = arith.constant 3.200000e+01 : f32
    %114 = vector.broadcast %cst_45 : f32 to vector<8x1xf32>
    %115 = arith.divf %113, %114 : vector<8x1xf32>
    %116 = vector.broadcast %108 : vector<8x1xf32> to vector<8x32xf32>
    %117 = arith.subf %104, %116 : vector<8x32xf32>
    %cst_46 = arith.constant 9.99999996E-13 : f32
    %118 = vector.broadcast %cst_46 : f32 to vector<8x1xf32>
    %119 = arith.addf %115, %118 : vector<8x1xf32>
    %120 = math.rsqrt %119 : vector<8x1xf32>
    %121 = vector.broadcast %120 : vector<8x1xf32> to vector<8x32xf32>
    %122 = arith.mulf %117, %121 : vector<8x32xf32>
    %c0_47 = arith.constant 0 : index
    %c0_48 = arith.constant 0 : index
    %123 = vector.load %arg12[%c0_47, %c0_48] : memref<1x32xf32, #tpu.memory_space<vmem>>, vector<1x32xf32>
    %124 = vector.broadcast %123 : vector<1x32xf32> to vector<8x32xf32>
    %125 = arith.mulf %122, %124 : vector<8x32xf32>
    %c0_49 = arith.constant 0 : index
    %c0_50 = arith.constant 0 : index
    %126 = vector.load %arg13[%c0_49, %c0_50] : memref<1x32xf32, #tpu.memory_space<vmem>>, vector<1x32xf32>
    %127 = vector.broadcast %126 : vector<1x32xf32> to vector<8x32xf32>
    %128 = arith.addf %125, %127 : vector<8x32xf32>
    %c0_51 = arith.constant 0 : index
    %c0_52 = arith.constant 0 : index
    %c0_53 = arith.constant 0 : index
    %129 = vector.load %arg14[%c0_51, %c0_52, %c0_53] : memref<1x8x32xf32, #tpu.memory_space<vmem>>, vector<1x8x32xf32>
    %130 = vector.shape_cast %129 : vector<1x8x32xf32> to vector<8x32xf32>
    %131 = vector.shape_cast %128 : vector<8x32xf32> to vector<1x8x32xf32>
    tpu.vector_store %arg14[%c0_51, %c0_52, %c0_53], %131 {strides = array<i32>} : memref<1x8x32xf32, #tpu.memory_space<vmem>>, vector<1x8x32xf32>,
    return
  }
  func.func @transform_0(%arg0: i32, %arg1: memref<1xi32, #tpu.memory_space<smem>>) -> (i32, i32, i32) {
    %c0_i32 = arith.constant 0 : i32
    %c0_i32_0 = arith.constant 0 : i32
    %c0_i32_1 = arith.constant 0 : i32
    return %arg0, %c0_i32, %c0_i32_0 : i32, i32, i32
  }
  func.func @transform_1(%arg0: i32, %arg1: memref<1xi32, #tpu.memory_space<smem>>) -> (i32, i32, i32) {
    %c0_i32 = arith.constant 0 : i32
    %c0_i32_0 = arith.constant 0 : i32
    %c0_i32_1 = arith.constant 0 : i32
    return %arg0, %c0_i32, %c0_i32_0 : i32, i32, i32
  }
  func.func @transform_2(%arg0: i32, %arg1: memref<1xi32, #tpu.memory_space<smem>>) -> (i32, i32) {
    %c0_i32 = arith.constant 0 : i32
    %c0_i32_0 = arith.constant 0 : i32
    %c0_i32_1 = arith.constant 0 : i32
    return %c0_i32, %c0_i32_0 : i32, i32
  }
  func.func @transform_3(%arg0: i32, %arg1: memref<1xi32, #tpu.memory_space<smem>>) -> (i32, i32) {
    %c0_i32 = arith.constant 0 : i32
    %c0_i32_0 = arith.constant 0 : i32
    %c0_i32_1 = arith.constant 0 : i32
    return %c0_i32, %c0_i32_0 : i32, i32
  }
  func.func @transform_4(%arg0: i32, %arg1: memref<1xi32, #tpu.memory_space<smem>>) -> (i32, i32) {
    %c0_i32 = arith.constant 0 : i32
    %c0_i32_0 = arith.constant 0 : i32
    %c0_i32_1 = arith.constant 0 : i32
    return %c0_i32, %c0_i32_0 : i32, i32
  }
  func.func @transform_5(%arg0: i32, %arg1: memref<1xi32, #tpu.memory_space<smem>>) -> (i32, i32) {
    %c0_i32 = arith.constant 0 : i32
    %c0_i32_0 = arith.constant 0 : i32
    %c0_i32_1 = arith.constant 0 : i32
    return %c0_i32, %c0_i32_0 : i32, i32
  }
  func.func @transform_6(%arg0: i32, %arg1: memref<1xi32, #tpu.memory_space<smem>>) -> (i32, i32) {
    %c0_i32 = arith.constant 0 : i32
    %c0_i32_0 = arith.constant 0 : i32
    %c0_i32_1 = arith.constant 0 : i32
    return %c0_i32, %c0_i32_0 : i32, i32
  }
  func.func @transform_7(%arg0: i32, %arg1: memref<1xi32, #tpu.memory_space<smem>>) -> (i32, i32) {
    %c0_i32 = arith.constant 0 : i32
    %c0_i32_0 = arith.constant 0 : i32
    %c0_i32_1 = arith.constant 0 : i32
    return %c0_i32, %c0_i32_0 : i32, i32
  }
  func.func @transform_8(%arg0: i32, %arg1: memref<1xi32, #tpu.memory_space<smem>>) -> (i32, i32, i32) {
    %c0_i32 = arith.constant 0 : i32
    %c0_i32_0 = arith.constant 0 : i32
    %c0_i32_1 = arith.constant 0 : i32
    %c0_i32_2 = arith.constant 0 : i32
    return %c0_i32, %c0_i32_0, %c0_i32_1 : i32, i32, i32
  }
  func.func @transform_9(%arg0: i32, %arg1: memref<1xi32, #tpu.memory_space<smem>>) -> (i32, i32) {
    %c0_i32 = arith.constant 0 : i32
    %c0_i32_0 = arith.constant 0 : i32
    %c0_i32_1 = arith.constant 0 : i32
    return %c0_i32, %c0_i32_0 : i32, i32
  }
  func.func @transform_10(%arg0: i32, %arg1: memref<1xi32, #tpu.memory_space<smem>>) -> (i32, i32) {
    %c0_i32 = arith.constant 0 : i32
    %c0_i32_0 = arith.constant 0 : i32
    %c0_i32_1 = arith.constant 0 : i32
    return %c0_i32, %c0_i32_0 : i32, i32
  }
  func.func @transform_11(%arg0: i32, %arg1: memref<1xi32, #tpu.memory_space<smem>>) -> (i32, i32) {
    %c0_i32 = arith.constant 0 : i32
    %c0_i32_0 = arith.constant 0 : i32
    %c0_i32_1 = arith.constant 0 : i32
    return %c0_i32, %c0_i32_0 : i32, i32
  }
  func.func @transform_12(%arg0: i32, %arg1: memref<1xi32, #tpu.memory_space<smem>>) -> (i32, i32, i32) {
    %c0_i32 = arith.constant 0 : i32
    %c0_i32_0 = arith.constant 0 : i32
    %c0_i32_1 = arith.constant 0 : i32
    return %arg0, %c0_i32, %c0_i32_0 : i32, i32, i32
  }
}

</mosaic_0001>

<bundles_post_ra>
// kernel: tpu_custom_call.1
= control target key start
LH: loop header
LB: loop body
LE: loop exit
PB: predicated region body
PF: predicated region fallthrough
CT: control target
= control target key end

     0   :  { %s2683_s0 = inlined_call_operand.<no memory space> [shape: s32[1], index: 0, kind: input, shape index: {}]   ;;  %s2684_s1 = inlined_call_operand.hbm [shape: bf16[2,8,32], index: 1, kind: input, shape index: {}]   ;;  %s2685_s2 = inlined_call_operand.vmem [shape: f32[2,1,8], index: 2, kind: input, shape index: {}]   ;;  %s2686_s3 = inlined_call_operand.hbm [shape: bf16[32,32], index: 3, kind: input, shape index: {}]   ;;  %s2687_s4 = inlined_call_operand.hbm [shape: f32[1,32], index: 4, kind: input, shape index: {}]   ;;  %s2688_s5 = inlined_call_operand.vmem [shape: bf16[32,32], index: 5, kind: input, shape index: {}]   ;;  %s2689_s6 = inlined_call_operand.hbm [shape: f32[1,32], index: 6, kind: input, shape index: {}]   ;;  %s2690_s7 = inlined_call_operand.hbm [shape: bf16[32,32], index: 7, kind: input, shape index: {}]   ;;  %s2691_s8 = inlined_call_operand.hbm [shape: f32[1,32], index: 8, kind: input, shape index: {}]   ;;  %s2692_s9 = inlined_call_operand.vmem [shape: bf16[2,16,32], index: 9, kind: input, shape index: {}]   ;;  %s2693_s10 = inlined_call_operand.vmem [shape: f32[1,32], index: 10, kind: input, shape index: {}]   ;;  %s2694_s11 = inlined_call_operand.vmem [shape: f32[1,32], index: 11, kind: input, shape index: {}]   ;;  %s2695_s12 = inlined_call_operand.vmem [shape: f32[1,32], index: 12, kind: input, shape index: {}]   ;;  %s2696_s13 = inlined_call_operand.hbm [shape: f32[2,8,32], index: 13, kind: output, shape index: {}]  }
   0x1   :  { %2702 = sst [smem:[#allocation21_spill]] %s2684_s1 }
   0x2   :  { %2703 = sst [smem:[#allocation22_spill]] %s2685_s2 }
   0x3   :  { %2704 = sst [smem:[#allocation23_spill]] %s2693_s10 }
   0x4   :  { %2705 = sst [smem:[#allocation24_spill]] %s2694_s11 }
   0x5   :  { %2706 = sst [smem:[#allocation25_spill]] %s2695_s12 }
   0x6   :  { %2707 = sst [smem:[#allocation26_spill]] %s2696_s13 }
   0x7   :  { %18 = sst [smem:[#allocation3]] %s2683_s0 }
   0x8   :  { %19 = vsyncpa [#allocation5], 0 }
   0x9   :  { %21 = vsyncpa [#allocation5 + $0x1], 0 }
   0xa   :  { %22 = vsyncpa [#allocation8], 0 }
   0xb   :  { %23 = vsyncpa [#allocation11], 0 }
   0xc   :  { %24 = vsyncpa [#allocation14], 0 }
   0xd   :  { %25 = vsyncpa [#allocation6], 0 }
   0xe   :  { %27 = vsyncpa [#allocation6 + $0x1], 0  ;;  %s2217_s27 = smov 0   ;;  %s2219_s28 = smov 0  }
   0xf   :  { %s2221_s29 = smov 0   ;;  %s2223_s30 = smov 0  }
  0x10 LB: > { %s2130_s0 = smov [#allocation7]   ;;  %s2238_s15 = sadd.s32 4294967295, %s2128_s30   ;;  %s2128_s30 = sphi %s2223_s30, %s2736_s30   ;;  %s2124_s29 = sphi %s2221_s29, %s2735_s29   ;;  %s2120_s28 = sphi %s2219_s28, %s2734_s28   ;;  %s2116_s27 = sphi %s2217_s27, %s2733_s27  }
  0x11   : > { %s338_s14 = sshll.u32 %s2130_s0, 4  ;;  %p1626_p0 = scmp.ge.s32.totalorder %s2128_s30, 1  ;;  %s2243_s14 = int_to_ptr.vmem [resolvable:$true] %s338_s14 }
  0x12   : > { %p2699_p1 = scmp.eq.s32.totalorder %s2238_s15, 0  ;;  %p326_p2 = scmp.lt.s32.totalorder %s2128_s30, 3 }
  0x13   : > { %s2131_s17 = smov [#allocation10]   ;;  %s2132_s20 = smov [#allocation9]  }
  0x14   : > { %p2245_p3 = pnand %p1626_p0, %p326_p2  ;;  %s366_s18 = sshll.u32 %s2131_s17, 4  ;;  %s2258_s18 = int_to_ptr.vmem [resolvable:$true] %s366_s18 }
  0x15   : > { %s352_s21 = sshll.u32 %s2132_s20, 4  ;;  %s1880_s24 = scalar_lea.hbm %s2686_s3, 256  ;;  %s2260_s21 = int_to_ptr.vmem [resolvable:$true] %s352_s21 }
  0x16   : > { %s2708_s16 = scalar_select %p2245_p3, 1, 0 }
  0x17   : > { %p1782_p5 = pneg %p2245_p3  ;;  %p1881_p7 = scmp.ne.s32.totalorder %s2686_s3, %s1880_s24 }
  0x18   : > { %p1887_p11 = scmp.lt.u32.totalorder %s1880_s24, %s2686_s3 }
  0x19   : > { %p2254_p6 = pnand %p1782_p5, %p2699_p1 }
  0x1b   : > { %p2270_p8 = pneg %p2254_p6 }
  0x1d   : > { %p1883_p9 = pnand %p2270_p8, %p1881_p7 }
  0x1f   : > { %p1884_p10 = pneg %p1883_p9 }
  0x21   : > { %p1889_p12 = pnand %p1887_p11, %p1884_p10 }
  0x23   : > { %1892 = shalt.err (!%p1889_p12)
}
  0x24   : > { %s1893_s22 = scalar_lea.vmem %s2243_s14, 256  ;;  %p1901_p5 = scmp.lt.s32.totalorder %s2243_s14, %s2243_s14 }
  0x25   : > { %p1894_p13 = scmp.ne.s32.totalorder %s2243_s14, %s1893_s22  ;;  %p1902_p4 = scmp.lt.s32.totalorder %s1893_s22, %s1893_s22 }
  0x27   : > { %p1896_p0 = pnand %p1894_p13, %p2270_p8  ;;  %p1903_p7 = por %p1902_p4, %p1901_p5 }
  0x29   : > { %p1897_p2 = pneg %p1896_p0 }
  0x2b   : > { %p1904_p9 = pnand %p1903_p7, %p1897_p2 }
  0x2d   : > { %1907 = shalt.err (!%p1904_p9)
}
  0x2e   : > { %s2698_s23 = smov 64   ;;  %s2134_s24 = smov 4  }
  0x2f   : > { %1785 = dma.hbm_to_vmem [thread:$0]  (!%p2254_p6), %s2686_s3, 256, %s2243_s14, [#allocation8], %s2698_s23, %s2698_s23, %s2134_s24  }
  0x30   : > { %s1908_s22 = scalar_lea.hbm %s2689_s6, 16 }
  0x31   : > { %p1909_p4 = scmp.ne.s32.totalorder %s2689_s6, %s1908_s22  ;;  %p1915_p12 = scmp.lt.u32.totalorder %s1908_s22, %s2689_s6 }
  0x33   : > { %p1911_p10 = pnand %p1909_p4, %p2270_p8 }
  0x35   : > { %p1912_p11 = pneg %p1911_p10 }
  0x37   : > { %p1917_p13 = pnand %p1915_p12, %p1912_p11 }
  0x39   : > { %1920 = shalt.err (!%p1917_p13)
}
  0x3a   : > { %s1921_s14 = scalar_lea.vmem %s2258_s18, 16  ;;  %s1928_s12 = scalar_lea.vmem %s2258_s18, 32 }
  0x3b   : > { %p1922_p0 = scmp.ne.s32.totalorder %s2258_s18, %s1921_s14  ;;  %p1929_p7 = scmp.lt.s32.totalorder %s2258_s18, %s2258_s18 }
  0x3c   : > { %p1930_p9 = scmp.lt.s32.totalorder %s1928_s12, %s1921_s14 }
  0x3d   : > { %p1924_p2 = pnand %p1922_p0, %p2270_p8 }
  0x3e   : > { %p1931_p4 = por %p1930_p9, %p1929_p7 }
  0x3f   : > { %p1925_p5 = pneg %p1924_p2 }
  0x41   : > { %p1932_p10 = pnand %p1931_p4, %p1925_p5 }
  0x43   : > { %1935 = shalt.err (!%p1932_p10)
}
  0x44   : > { %1791 = dma.hbm_to_vmem [thread:$0]  (!%p2254_p6), %s2689_s6, 16, %s2258_s18, [#allocation11]  }
  0x45   : > { %s1936_s26 = scalar_lea.hbm %s2687_s4, 16 }
  0x46   : > { %p1937_p11 = scmp.ne.s32.totalorder %s2687_s4, %s1936_s26  ;;  %p1943_p0 = scmp.lt.u32.totalorder %s1936_s26, %s2687_s4 }
  0x48   : > { %p1939_p12 = pnand %p1937_p11, %p2270_p8 }
  0x4a   : > { %p1940_p13 = pneg %p1939_p12 }
  0x4c   : > { %p1945_p2 = pnand %p1943_p0, %p1940_p13 }
  0x4e   : > { %1948 = shalt.err (!%p1945_p2)
}
  0x4f   : > { %s1949_s18 = scalar_lea.vmem %s2260_s21, 16  ;;  %s1956_s12 = scalar_lea.vmem %s2260_s21, 32 }
  0x50   : > { %p1950_p5 = scmp.ne.s32.totalorder %s2260_s21, %s1949_s18  ;;  %p1957_p4 = scmp.lt.s32.totalorder %s2260_s21, %s2260_s21 }
  0x51   : > { %p1958_p10 = scmp.lt.s32.totalorder %s1956_s12, %s1949_s18 }
  0x52   : > { %p1952_p7 = pnand %p1950_p5, %p2270_p8 }
  0x53   : > { %p1959_p11 = por %p1958_p10, %p1957_p4 }
  0x54   : > { %p1953_p9 = pneg %p1952_p7 }
  0x56   : > { %p1960_p12 = pnand %p1959_p11, %p1953_p9 }
  0x58   : > { %1963 = shalt.err (!%p1960_p12)
}
  0x59   : > { %1788 = dma.hbm_to_vmem [thread:$0]  (!%p2254_p6), %s2687_s4, 16, %s2260_s21, [#allocation8]  }
  0x5a   : > { %s2135_s13 = smov [#allocation12]   ;;  %s2136_s26 = smov [#allocation13]  }
  0x5b   : > { %s376_s25 = sshll.u32 %s2135_s13, 4  ;;  %s390_s17 = sshll.u32 %s2136_s26, 4  ;;  %s377_s25 = int_to_ptr.vmem [resolvable:$true] %s376_s25  ;;  %s391_s17 = int_to_ptr.vmem [resolvable:$true] %s390_s17 }
  0x5c   : > { %s1964_s14 = scalar_lea.hbm %s2690_s7, 256 }
  0x5d   : > { %p1965_p13 = scmp.ne.s32.totalorder %s2690_s7, %s1964_s14  ;;  %p1971_p5 = scmp.lt.u32.totalorder %s1964_s14, %s2690_s7 }
  0x5f   : > { %p1967_p0 = pnand %p1965_p13, %p2270_p8 }
  0x61   : > { %p1968_p2 = pneg %p1967_p0 }
  0x63   : > { %p1973_p7 = pnand %p1971_p5, %p1968_p2 }
  0x65   : > { %1976 = shalt.err (!%p1973_p7)
}
  0x66   : > { %s1977_s21 = scalar_lea.vmem %s377_s25, 256  ;;  %p1985_p11 = scmp.lt.s32.totalorder %s377_s25, %s377_s25 }
  0x67   : > { %p1978_p9 = scmp.ne.s32.totalorder %s377_s25, %s1977_s21  ;;  %p1986_p12 = scmp.lt.s32.totalorder %s1977_s21, %s1977_s21 }
  0x69   : > { %p1980_p4 = pnand %p1978_p9, %p2270_p8  ;;  %p1987_p1 = por %p1986_p12, %p1985_p11 }
  0x6b   : > { %p1981_p10 = pneg %p1980_p4 }
  0x6d   : > { %p1988_p3 = pnand %p1987_p1, %p1981_p10 }
  0x6f   : > { %1991 = shalt.err (!%p1988_p3)
}
  0x70   : > { %s2711_s11 = smov 64   ;;  %s1992_s22 = scalar_lea.hbm %s2691_s8, 16 }
  0x71   : > { %1794 = dma.hbm_to_vmem [thread:$0]  (!%p2254_p6), %s2690_s7, 256, %s377_s25, [#allocation11], %s2711_s11, %s2711_s11, %s2134_s24  }
  0x72   : > { %p1993_p1 = scmp.ne.s32.totalorder %s2691_s8, %s1992_s22  ;;  %p1999_p0 = scmp.lt.u32.totalorder %s1992_s22, %s2691_s8 }
  0x74   : > { %p1995_p3 = pnand %p1993_p1, %p2270_p8 }
  0x76   : > { %p1996_p13 = pneg %p1995_p3 }
  0x78   : > { %p2001_p2 = pnand %p1999_p0, %p1996_p13 }
  0x7a   : > { %2004 = shalt.err (!%p2001_p2)
}
  0x7b   : > { %s2005_s21 = scalar_lea.vmem %s391_s17, 16  ;;  %s2012_s24 = scalar_lea.vmem %s391_s17, 32 }
  0x7c   : > { %p2006_p5 = scmp.ne.s32.totalorder %s391_s17, %s2005_s21  ;;  %p2013_p4 = scmp.lt.s32.totalorder %s391_s17, %s391_s17 }
  0x7d   : > { %p2014_p10 = scmp.lt.s32.totalorder %s2012_s24, %s2005_s21 }
  0x7e   : > { %p2008_p7 = pnand %p2006_p5, %p2270_p8 }
  0x7f   : > { %p2015_p11 = por %p2014_p10, %p2013_p4 }
  0x80   : > { %p2009_p9 = pneg %p2008_p7 }
  0x82   : > { %p2016_p12 = pnand %p2015_p11, %p2009_p9 }
  0x84   : > { %2019 = shalt.err (!%p2016_p12)
}
  0x85   : > { %1797 = dma.hbm_to_vmem [thread:$0]  (!%p2254_p6), %s2691_s8, 16, %s391_s17, [#allocation14]  }
  0x86   : > { %s1625_s0 = sadd.s32 4294967294, %s2128_s30   ;;  %s2383_s19 = sadd.s32 1, %s2128_s30  }
  0x87   : > { %s40_s23 = sadd.s32 1, %s2124_s29  ;;  %s37_s13 = ssub.s32 %s2128_s30, %s2383_s19 }
  0x88   : > { %p47_p8 = scmp.ne.s32.totalorder %s2124_s29, %s2120_s28  ;;  %p38_p1 = scmp.eq.s32.totalorder %s37_s13, 0 }
  0x89   : > { %p48_p3 = scmp.eq.s32.totalorder %s2128_s30, 0  ;;  %p53_p13 = scmp.ne.s32.totalorder %s2120_s28, %s2116_s27 }
  0x8a   : > { %p313_p0 = scmp.eq.s32.totalorder %s2238_s15, 1  ;;  %p2712_p5 = scmp.eq.s32.totalorder %s2238_s15, 0 }
  0x8b   : > { %s2395_s26 = scalar_select %p38_p1, %s2124_s29, %s40_s23  }
  0x8c   : > { %p49_p2 = por %p48_p3, %p47_p8  ;;  %p2399_p7 = por %p2712_p5, %p53_p13 }
  0x8d   : > { %p2403_p6 = por %p313_p0, %p47_p8  ;;  %p319_p9 = scmp.eq.s32.totalorder %s1625_s0, 1 }
  0x8e   : > { %p1811_p4 = scmp.lt.s32.totalorder %s2128_s30, 2  ;;  %s413_s22 = sand.u32 1, %s2124_s29  }
  0x8f   : > { %s2714_s17 = scalar_select %p2403_p6, 1, 0 }
  0x90   : > { %p2409_p10 = por %p319_p9, %p53_p13  ;;  %s1633_s18 = sshll.u32 %s413_s22, 2 }
  0x91   : > { %s1634_s12 = sshll.u32 %s2128_s30, 6  ;;  %s2716_s1 = sld [smem:[#allocation21_spill]] }
  0x92   : > { %s2715_s14 = scalar_select %p2409_p10, 1, 0 }
  0x93   : > { %s417_s25 = scalar_lea.vmem [#allocation4], %s1633_s18  ;;  %p2419_p11 = pnand %p1811_p4, %p49_p2 }
  0x94   : > { %s424_s11 = sshll.u32 %s417_s25, 4  ;;  %s414_s23 = scalar_lea.sflag [#allocation5], %s413_s22  ;;  %s2423_s11 = int_to_ptr.vmem [resolvable:$true] %s424_s11 }
  0x95   : > { %p2022_p8 = pneg %p2419_p11 }
  0x97   : > { %s2417_s24 = scalar_lea.hbm %s2716_s1, %s1634_s12  ;;  %s2025_s10 = scalar_lea.hbm %s2716_s1, 128 }
  0x98   : > { %s2020_s13 = scalar_lea.hbm %s2417_s24, 64  ;;  %p2026_p13 = scmp.lt.u32.totalorder %s2417_s24, %s2716_s1 }
  0x99   : > { %p2021_p12 = scmp.ne.s32.totalorder %s2417_s24, %s2020_s13  ;;  %p2027_p0 = scmp.lt.u32.totalorder %s2025_s10, %s2020_s13 }
  0x9a   : > { %p2029_p5 = scmp.lt.u32.totalorder %s2020_s13, %s2417_s24 }
  0x9b   : > { %p2023_p1 = pnand %p2022_p8, %p2021_p12  ;;  %p2028_p2 = por %p2027_p0, %p2026_p13 }
  0x9d   : > { %p2024_p3 = pneg %p2023_p1  ;;  %p2030_p9 = por %p2029_p5, %p2028_p2 }
  0x9f   : > { %p2031_p4 = pnand %p2030_p9, %p2024_p3 }
  0xa1   : > { %2034 = shalt.err (!%p2031_p4)
}
  0xa2   : > { %s2035_s22 = scalar_lea.vmem %s2423_s11, 64  ;;  %s2137_s12 = smov [#allocation4]  }
  0xa3   : > { %p2036_p12 = scmp.ne.s32.totalorder %s2423_s11, %s2035_s22  ;;  %s2040_s18 = sshll.u32 %s2137_s12, 4  ;;  %s2041_s18 = int_to_ptr.vmem [resolvable:$false] %s2040_s18 }
  0xa4   : > { %s2042_s21 = scalar_lea.vmem %s2041_s18, 128  ;;  %p2043_p6 = scmp.lt.s32.totalorder %s2423_s11, %s2041_s18 }
  0xa5   : > { %p2038_p1 = pnand %p2036_p12, %p2022_p8  ;;  %p2044_p13 = scmp.lt.s32.totalorder %s2042_s21, %s2035_s22 }
  0xa7   : > { %p2039_p10 = pneg %p2038_p1  ;;  %p2045_p0 = por %p2044_p13, %p2043_p6 }
  0xa9   : > { %p2046_p2 = pnand %p2045_p0, %p2039_p10 }
  0xab   : > { %2049 = shalt.err (!%p2046_p2)
}
  0xac   : > { %1801 = dma.hbm_to_vmem [thread:$0]  (!%p2419_p11), %s2417_s24, 64, %s2423_s11, %s414_s23  }
  0xad   : > { %p2718_p3 = scmp.ne.s32.totalorder %s2708_s16, 0 }
  0xae   : > { %s2453_s13 = sand.u32 (!%p2718_p3), 1, %s2120_s28  }
  0xaf   : > { %439 = sbr.rel (%p2718_p3) target bundleno = 1703 (0x6a7), region = 68  ;;  %s1636_s10 = sshll.u32 (!%p2718_p3), %s2453_s13, 2 }
  0xb0   : > { %s442_s25 = scalar_lea.sflag (!%p2718_p3), [#allocation5], %s2453_s13  ;;  %s445_s22 = scalar_lea.vmem (!%p2718_p3), [#allocation4], %s1636_s10 }
  0xb6   : > { %2095 = dma.done.wait (%p2399_p7), %s442_s25, 64  }
  0xb7   : > { %2097 = vsyncadd (%p2399_p7), %s442_s25, 4294967232  ;;  %p2719_p6 = scmp.eq.s32.totalorder %s2238_s15, 0 }
  0xb9   : > { %2099 = dma.done.wait (%p2719_p6), [#allocation8], 272   ;;  %p2720_p10 = pmov %p2719_p6 }
  0xba   : > { %p2721_p11 = pmov %p2719_p6 }
  0xbb   : > { %2101 = vsyncadd (%p2720_p10), [#allocation8], 4294967024 }
  0xbc   : > { %2103 = dma.done.wait (%p2721_p11), [#allocation11], 272   ;;  %p2722_p8 = pmov %p2719_p6 }
  0xbd   : > { %p2723_p5 = pmov %p2719_p6 }
  0xbe   : > { %2105 = vsyncadd (%p2722_p8), [#allocation11], 4294967024 }
  0xbf   : > { %2107 = dma.done.wait (%p2723_p5), [#allocation14], 16   ;;  %p2724_p9 = pmov %p2723_p5 }
  0xc0   : > { %v2138_v0 = vmov 0.0   ;;  %vm2139_vm0 = vmmov 0   ;;  %v1862_v1 = vld [vmem:[%s2688_s5] sm:$0xff]   ;;  %v1863_v2 = vld [vmem:[#allocation7] sm:$0xff]   ;;  %vm541_vm1 = vcmask 261120   ;;  %v1865_v5 = vld [vmem:[#allocation7 + $0x8] sm:$0xff]   ;;  %v719_v28 = vlaneseq }
  0xc1   : > { %2109 = vsyncadd (%p2724_p9), [#allocation14], 4294967280  ;;  %1706 = vmatprep.subr.bf16.mxu1 %v2138_v0  ;;  %1698 = vmatprep.subr.bf16.mxu0 %v2138_v0  ;;  %v1864_v3 = vld [vmem:[%s2688_s5 + $0x8] sm:$0xff]   ;;  %v2487_v4 = vld [vmem:[%s445_s22] sm:$0xf]  ;;  %s2140_s0 = smov 112  }
  0xc2   : > { %1710 = vmatprep.mubr.msk.bf16.mxu1 %vm2139_vm0, %v2138_v0  ;;  %1702 = vmatprep.mubr.msk.bf16.mxu0 %vm2139_vm0, %v2138_v0  ;;  %v1866_v6 = vld [vmem:[#allocation12] sm:$0xff]   ;;  %v1867_v7 = vld [vmem:[#allocation12 + $0x8] sm:$0xff]   ;;  %v1647_v8 = vld [vmem:[#allocation10] ss:$0 sm:$0xff]  ;;  %v2141_v26 = vmov 1983009808  }
  0xc3   : > { %1707 = vmatpush3.bf16.msra.mxu1 %v1862_v1  ;;  %1699 = vmatpush3.bf16.msra.mxu0 %v1863_v2  ;;  %v1643_v10 = vld [vmem:[#allocation9] ss:$0 sm:$0xff]  ;;  %v1651_v20 = vld [vmem:[#allocation13] ss:$0 sm:$0xff]  ;;  %v717_v27 = vunpack.c.l.s4 %v2141_v26  ;;  %v2509_v30 = vshrl.u32 %v719_v28, 7  ;;  %vm1084_vm2 = vcmask 130048  }
  0xc4   : > { %1708 = vmatprep.subr.bf16.mxu1 %v2138_v0  ;;  %1700 = vmatprep.subr.bf16.mxu0 %v2138_v0  ;;  %v2142_v31 = vmov 1934713408   ;;  %vm1233_vm3 = vcmask 1043456   ;;  %p509_p7 = scmp.lt.s32.totalorder %s2238_s15, 1  ;;  %s2725_s2 = sld [smem:[#allocation22_spill]]  ;;  %vm1177_vm4 = vcmask 64512  }
  0xc5   : > { %v718_v29 = vunpack.c.0.s8 %v717_v27  ;;  %v748_v32 = vunpack.c.l.s4 %v2142_v31  ;;  %s513_s10 = sld [smem:[#allocation3]]  ;;  %s514_s25 = smul.u32 2654435769, %s2238_s15 }
  0xc6   : > { %s510_s23 = scalar_select %p509_p7, %s2238_s15, 1 }
  0xc7   : > { %1709 = vmatpush3.bf16.msra.mxu1 %v1864_v3  ;;  %1701 = vmatpush3.bf16.msra.mxu0 %v1865_v5  ;;  %v2512_v33 = vsub.s32 %v718_v29, %v2509_v30  ;;  %v749_v34 = vunpack.c.0.s8 %v748_v32  ;;  %s2728_s11 = sld [smem:[#allocation25_spill]]  ;;  %s2729_s1 = sld [smem:[#allocation26_spill]] }
  0xc8   : > { %1722 = vmatprep.subr.bf16.mxu1 %v2138_v0  ;;  %1714 = vmatprep.subr.bf16.mxu0 %v2138_v0  ;;  %p2730_p12 = scmp.ne.s32.totalorder %s2714_s17, 0 }
  0xc9   : > { %v2517_v38 = vsub.s32 %v749_v34, %v2509_v30 }
  0xca   : > { %1711 = vmatmul.mubr.msk.bf16.vlgmr.msra.gmra.mrb[0].mxu1 %vm541_vm1, %v2487_v4  ;;  %1703 = vmatmul.mubr.msk.bf16.vlgmr.msra.gmra.mrb[0].mxu0 %vm541_vm1, %v2487_v4  ;;  %s511_s21 = scalar_lea.vmem %s2725_s2, %s510_s23 }
  0xcb   : > { %1724 = vmatprep.mubr.msk.bf16.mxu1 %vm2139_vm0, %v2138_v0  ;;  %1718 = vmatprep.mubr.msk.bf16.mxu0 %vm2139_vm0, %v2138_v0  ;;  %s2587_s22 = sxor.u32 %s514_s25, %s513_s10  ;;  %s1642_s10 = sshll.u32 %s2453_s13, 3 }
  0xcc   : > { %1715 = vmatpush3.bf16.msra.mxu0 %v1866_v6  ;;  %s1203_s16 = sadd.s32 1187967562, %s2587_s22  ;;  %s1440_s23 = sadd.s32 1463923124, %s2587_s22 }
  0xcd   : > { %1716 = vmatprep.subr.bf16.mxu0 %v2138_v0  ;;  %s1485_s25 = scalar_lea.sflag [#allocation6], %s2453_s13 }
  0xd0   : > { %1717 = vmatpush3.bf16.msra.mxu0 %v1867_v7 }
  0xd1   : > { %1728 = vmatprep.subr.bf16.mxu0 %v2138_v0 }
  0xd3   : > { %1719 = vmatmul.mubr.msk.bf16.vlgmr.msra.gmra.mrb[4].mxu0 %vm541_vm1, %v2487_v4 }
  0xd4   : > { %1730 = vmatprep.mubr.msk.bf16.mxu0 %vm2139_vm0, %v2138_v0 }
 0x19d   : > { %v642_v9 = vpop.f32.mrb[0].mxu1  ;;  %v579_v13 = vpop.f32.mrb[0].mxu0 }
 0x19e   : > { %v643_v11 = vadd.f32 %v1647_v8, %v642_v9  ;;  %v1712_v12 = vpop.f32.mrb[1].mxu1  ;;  %v1704_v15 = vpop.f32.mrb[1].mxu0  ;;  %v580_v17 = vadd.f32 %v1643_v10, %v579_v13 }
 0x19f   : > { %v645_v14 = vpop.f32.mrb[2].mxu1  ;;  %v582_v18 = vpop.f32.mrb[2].mxu0 }
 0x1a0   : > { %834 = vrot.lane.b32.xlu0 %v643_v11, %s2140_s0  ;;  %v1713_v16 = vpop.f32.mrb[3].mxu1  ;;  %v1705_v19 = vpop.f32.mrb[3].mxu0  ;;  %v837_v35 = vcombine.high %v643_v11, %v2138_v0  ;;  %v844_v37 = vrot.slane %v643_v11, %v2512_v33  ;;  %v715_v45 = vcombine.high %v580_v17, %v2138_v0  ;;  %v722_v51 = vrot.slane %v580_v17, %v2512_v33 }
 0x1a2   : > { %v851_v41 = vrot.slane %v837_v35, %v2512_v33  ;;  %v729_v58 = vrot.slane %v715_v45, %v2512_v33 }
 0x1a4   : > { %712 = vrot.lane.b32.xlu0 %v580_v17, %s2140_s0 }
 0x1a6   : > { %v705_v21 = vpop.f32.mrb[4].mxu0 }
 0x1a7   : > { %v2505_v22 = vadd.f32 %v1651_v20, %v705_v21  ;;  %v1720_v23 = vpop.f32.mrb[5].mxu0 }
 0x1a8   : > { %v708_v24 = vpop.f32.mrb[6].mxu0 }
 0x1a9   : > { %956 = vrot.lane.b32.xlu0 %v2505_v22, %s2140_s0  ;;  %v1721_v25 = vpop.f32.mrb[7].mxu0  ;;  %v966_v45 = vrot.slane %v2505_v22, %v2512_v33  ;;  %s1674_s0 = sshll.u32 %s2238_s15, 7  ;;  %s2143_s15 = smov [#allocation15]  }
 0x1aa   : > { %s2638_s2 = scalar_lea.hbm %s2729_s1, %s1674_s0 }
 0x212   : > { %v835_v36 = vpop.permute.xlu0 %834 }
 0x213   : > { %v852_v39 = vcombine.high %v835_v36, %v2138_v0  ;;  %v859_v40 = vrot.slane %v835_v36, %v2512_v33 }
 0x215   : > { %v866_v42 = vrot.slane %v852_v39, %v2512_v33  ;;  %v867_v43 = vcombine.low %v844_v37, %v859_v40  ;;  %v868_v44 = vcombine.high %v844_v37, %v859_v40 }
 0x216   : > { %v713_v46 = vpop.permute.xlu0 %712 }
 0x217   : > { %v875_v47 = vrot.slane %v867_v43, %v2517_v38  ;;  %v882_v48 = vrot.slane %v868_v44, %v2517_v38  ;;  %v883_v49 = vcombine.low %v851_v41, %v866_v42  ;;  %v884_v50 = vcombine.high %v851_v41, %v866_v42 }
 0x218   : > { %v730_v52 = vcombine.high %v713_v46, %v2138_v0  ;;  %v737_v53 = vrot.slane %v713_v46, %v2512_v33  ;;  %v959_v43 = vcombine.high %v2505_v22, %v2138_v0 }
 0x219   : > { %v891_v54 = vrot.slane %v883_v49, %v2517_v38  ;;  %v898_v55 = vrot.slane %v884_v50, %v2517_v38  ;;  %v903_v56 = vcombine.low %v875_v47, %v882_v48  ;;  %v1657_v57 = vcombine.high %v875_v47, %v882_v48 }
 0x21a   : > { %v744_v59 = vrot.slane %v730_v52, %v2512_v33  ;;  %v745_v60 = vcombine.low %v722_v51, %v737_v53  ;;  %v746_v61 = vcombine.high %v722_v51, %v737_v53  ;;  %v973_v46 = vrot.slane %v959_v43, %v2512_v33 }
 0x21b   : > { %v910_v62 = vrot.slane %v903_v56, %v2512_v33  ;;  %v918_v63 = vrot.slane %v1657_v57, %v2512_v33  ;;  %v919_v1 = vcombine.low %v891_v54, %v898_v55  ;;  %v1658_v2 = vcombine.high %v891_v54, %v898_v55  ;;  %v957_v44 = vpop.permute.xlu0 %956 }
 0x21c   : > { %v753_v3 = vrot.slane %v745_v60, %v2517_v38  ;;  %v760_v5 = vrot.slane %v746_v61, %v2517_v38  ;;  %v761_v6 = vcombine.low %v729_v58, %v744_v59  ;;  %v762_v7 = vcombine.high %v729_v58, %v744_v59 }
 0x21d   : > { %v926_v8 = vrot.slane %v919_v1, %v2512_v33  ;;  %v934_v9 = vrot.slane %v1658_v2, %v2512_v33  ;;  %v935_v10 = vcombine.low %v910_v62, %v918_v63  ;;  %v974_v47 = vcombine.high %v957_v44, %v2138_v0 }
 0x21e   : > { %v769_v11 = vrot.slane %v761_v6, %v2517_v38  ;;  %v776_v12 = vrot.slane %v762_v7, %v2517_v38  ;;  %v781_v13 = vcombine.low %v753_v3, %v760_v5  ;;  %v1655_v14 = vcombine.high %v753_v3, %v760_v5 }
 0x21f   : > { %v943_v15 = vcombine.low %v926_v8, %v934_v9  ;;  %v942_v20 = vrot.slane %v935_v10, %v2517_v38  ;;  %v981_v48 = vrot.slane %v957_v44, %v2512_v33  ;;  %v988_v49 = vrot.slane %v974_v47, %v2512_v33 }
 0x220   : > { %v788_v16 = vrot.slane %v781_v13, %v2512_v33  ;;  %v796_v17 = vrot.slane %v1655_v14, %v2512_v33  ;;  %v797_v18 = vcombine.low %v769_v11, %v776_v12  ;;  %v1656_v19 = vcombine.high %v769_v11, %v776_v12 }
 0x221   : > { %v950_v21 = vrot.slane %v943_v15, %v2517_v38  ;;  %v989_v50 = vcombine.low %v966_v45, %v981_v48  ;;  %v990_v51 = vcombine.high %v966_v45, %v981_v48  ;;  %v1005_v52 = vcombine.low %v973_v46, %v988_v49 }
 0x222   : > { %v804_v23 = vrot.slane %v797_v18, %v2512_v33  ;;  %v812_v24 = vrot.slane %v1656_v19, %v2512_v33  ;;  %v813_v25 = vcombine.low %v788_v16, %v796_v17  ;;  %v1006_v53 = vcombine.high %v973_v46, %v988_v49 }
 0x223   : > { %v951_v26 = vcombine.low %v942_v20, %v950_v21  ;;  %v952_v27 = vcombine.high %v942_v20, %v950_v21  ;;  %v997_v54 = vrot.slane %v989_v50, %v2517_v38  ;;  %v1004_v55 = vrot.slane %v990_v51, %v2517_v38 }
 0x224   : > { %v821_v29 = vcombine.low %v804_v23, %v812_v24  ;;  %v820_v35 = vrot.slane %v813_v25, %v2517_v38  ;;  %v1013_v56 = vrot.slane %v1005_v52, %v2517_v38  ;;  %v1020_v22 = vrot.slane %v1006_v53, %v2517_v38 }
 0x225   : > { %v953_v31 = vpack.c.bf16 %v951_v26, %v951_v26  ;;  %v954_v32 = vpack.c.bf16 %v952_v27, %v952_v27  ;;  %v1025_v57 = vcombine.low %v997_v54, %v1004_v55  ;;  %v1659_v58 = vcombine.high %v997_v54, %v1004_v55 }
 0x226   : > { %v828_v34 = vrot.slane %v821_v29, %v2517_v38  ;;  %v1041_v59 = vcombine.low %v1013_v56, %v1020_v22  ;;  %v1660_v60 = vcombine.high %v1013_v56, %v1020_v22  ;;  %v1202_v25 = vand.u32 127, %v719_v28 }
 0x227   : > { %v1089_v36 = vsel %vm1084_vm2, %v953_v31, 0  ;;  %v1135_v37 = vsel %vm1084_vm2, %v954_v32, 0  ;;  %v1032_v61 = vrot.slane %v1025_v57, %v2512_v33  ;;  %v1040_v62 = vrot.slane %v1659_v58, %v2512_v33 }
 0x228   : > { %1723 = vmatpush3.bf16.xpose.msra.mxu1 %v1089_v36  ;;  %1729 = vmatpush3.bf16.xpose.msra.mxu0 %v1135_v37  ;;  %v829_v39 = vcombine.low %v820_v35, %v828_v34  ;;  %v830_v40 = vcombine.high %v820_v35, %v828_v34  ;;  %v1048_v63 = vrot.slane %v1041_v59, %v2512_v33  ;;  %v1204_v26 = vmul.u32 2246822507, %v2509_v30 }
 0x229   : > { %1734 = vmatprep.subr.bf16.mxu1 %v2138_v0  ;;  %1740 = vmatprep.subr.bf16.mxu0 %v2138_v0  ;;  %v1056_v1 = vrot.slane %v1660_v60, %v2512_v33  ;;  %v1057_v2 = vcombine.low %v1032_v61, %v1040_v62  ;;  %v1661_v33 = vld [vmem:[%s511_s21] ss:$0 sm:$0xff]  ;;  %v1200_v27 = vadd.s32 8, %v2509_v30  ;;  %v1206_v29 = vstv %s1203_s16  ;;  %v1869_v62 = vld [vmem:[%s2692_s9 + $0x8] sm:$0xff]   ;;  %s2726_s21 = sld [smem:[#allocation23_spill]]  ;;  %s2727_s16 = sld [smem:[#allocation24_spill]] }
 0x22a   : > { %v831_v41 = vpack.c.bf16 %v829_v39, %v829_v39  ;;  %v832_v42 = vpack.c.bf16 %v830_v40, %v830_v40  ;;  %v1207_v31 = vxor.u32 %v1206_v29, %v1204_v26  ;;  %v2595_v32 = vmul.u32 3266489909, %v1202_v25  ;;  %v1868_v61 = vld [vmem:[%s2692_s9] sm:$0xff]  }
 0x22b   : > { %v1065_v3 = vcombine.low %v1048_v63, %v1056_v1  ;;  %v1064_v5 = vrot.slane %v1057_v2, %v2517_v38  ;;  %v1205_v34 = vmul.u32 2246822507, %v1200_v27 }
 0x22c   : > { %v1210_v35 = vxor.u32 %v2595_v32, %v1207_v31 }
 0x22d   : > { %v1072_v6 = vrot.slane %v1065_v3, %v2517_v38  ;;  %v1208_v36 = vxor.u32 %v1206_v29, %v1205_v34 }
 0x22e   : > { %v1212_v37 = vshrl.u32 %v1210_v35, 15 }
 0x22f   : > { %1725 = vmatmul.mubr.msk.bf16.vlgmr.msra.gmra.mrb[4].mxu1 %vm1084_vm2, %v831_v41  ;;  %1731 = vmatmul.mubr.msk.bf16.vlgmr.msra.gmra.mrb[8].mxu0 %vm1084_vm2, %v832_v42  ;;  %v1073_v7 = vcombine.low %v1064_v5, %v1072_v6  ;;  %v1074_v8 = vcombine.high %v1064_v5, %v1072_v6  ;;  %v1211_v39 = vxor.u32 %v2595_v32, %v1208_v36  ;;  %v1670_v30 = vld [vmem:[%s2726_s21] ss:$0 sm:$0xff] }
 0x230   : > { %1736 = vmatprep.mubr.msk.bf16.mxu1 %vm2139_vm0, %v2138_v0  ;;  %1742 = vmatprep.mubr.msk.bf16.mxu0 %vm2139_vm0, %v2138_v0  ;;  %v1214_v40 = vxor.u32 %v1212_v37, %v1210_v35 }
 0x231   : > { %v1075_v9 = vpack.c.bf16 %v1073_v7, %v1073_v7  ;;  %v1076_v10 = vpack.c.bf16 %v1074_v8, %v1074_v8  ;;  %v1213_v41 = vshrl.u32 %v1211_v39, 15 }
 0x232   : > { %v1216_v43 = vmul.u32 2146121005, %v1214_v40 }
 0x233   : > { %v1235_v11 = vsel %vm1233_vm3, %v1075_v9, 0  ;;  %v1281_v12 = vsel %vm1233_vm3, %v1076_v10, 0  ;;  %v1215_v44 = vxor.u32 %v1213_v41, %v1211_v39  ;;  %v517_v41 = vunpack.c.l.bf16 %v2487_v4 }
 0x234   : > { %1735 = vmatpush3.bf16.msra.mxu1 %v1235_v11  ;;  %1741 = vmatpush3.bf16.msra.mxu0 %v1281_v12  ;;  %v1218_v48 = vshrl.u32 %v1216_v43, 16 }
 0x235   : > { %1746 = vmatprep.subr.bf16.mxu1 %v2138_v0  ;;  %1752 = vmatprep.subr.bf16.mxu0 %v2138_v0  ;;  %v1217_v49 = vmul.u32 2146121005, %v1215_v44 }
 0x236   : > { %v1220_v51 = vxor.u32 %v1218_v48, %v1216_v43 }
 0x237   : > { %v1219_v52 = vshrl.u32 %v1217_v49, 16 }
 0x238   : > { %vm1222_vm5 = vcmp.ge.u32.totalorder %v1220_v51, 429496729 }
 0x239   : > { %v1221_v53 = vxor.u32 %v1219_v52, %v1217_v49 }
 0x23b   : > { %vm1223_vm6 = vcmp.ge.u32.totalorder %v1221_v53, 429496729  ;;  %v1671_v53 = vld [vmem:[%s2727_s16] ss:$0 sm:$0xff] }
 0x302   : > { %v1125_v38 = vpop.f32.mrb[4].mxu1  ;;  %v1171_v13 = vpop.f32.mrb[8].mxu0 }
 0x303   : > { %v1126_v14 = vadd.f32 %v1661_v33, %v1125_v38  ;;  %v1726_v15 = vpop.f32.mrb[5].mxu1  ;;  %v1732_v16 = vpop.f32.mrb[9].mxu0  ;;  %v1172_v19 = vadd.f32 %v1661_v33, %v1171_v13 }
 0x304   : > { %v1128_v17 = vpop.f32.mrb[6].mxu1  ;;  %v1174_v18 = vpop.f32.mrb[10].mxu0  ;;  %v1441_v16 = vstv %s1440_s23  ;;  %s508_s23 = scalar_lea.vmem [#allocation15], %s1642_s10  ;;  %s2054_s10 = sshll.u32 %s2143_s15, 4  ;;  %s2055_s10 = int_to_ptr.vmem [resolvable:$false] %s2054_s10 }
 0x305   : > { %v1727_v20 = vpop.f32.mrb[7].mxu1  ;;  %v1733_v21 = vpop.f32.mrb[11].mxu0  ;;  %v1178_v23 = vsel %vm1177_vm4, %v1126_v14, -inf  ;;  %v1181_v24 = vsel %vm1177_vm4, %v1172_v19, -inf  ;;  %v1442_v17 = vxor.u32 %v1441_v16, %v1204_v26  ;;  %s1498_s12 = sshll.u32 %s508_s23, 4  ;;  %s2056_s16 = scalar_lea.vmem %s2055_s10, 256  ;;  %s2640_s12 = int_to_ptr.vmem [resolvable:$true] %s1498_s12 }
 0x306   : > { %1179 = vmax.xlane.f32.xlu1 %v1178_v23  ;;  %s2050_s22 = scalar_lea.vmem %s2640_s12, 128  ;;  %p2057_p0 = scmp.lt.s32.totalorder %s2640_s12, %s2055_s10 }
 0x307   : > { %v1443_v18 = vxor.u32 %v1442_v17, %v2595_v32  ;;  %p2051_p4 = scmp.ne.s32.totalorder %s2640_s12, %s2050_s22  ;;  %p2058_p2 = scmp.lt.s32.totalorder %s2056_s16, %s2050_s22 }
 0x309   : > { %p2052_p1 = pnand %p2051_p4, %p2730_p12  ;;  %p2059_p3 = por %p2058_p2, %p2057_p0 }
 0x30a   : > { %1182 = vmax.xlane.f32.xlu1 %v1181_v24 }
 0x30b   : > { %p2053_p13 = pneg %p2052_p1 }
 0x30d   : > { %p2060_p6 = pnand %p2059_p3, %p2053_p13 }
 0x393   : > { %v1180_v28 = vpop.xlane.xlu1 %1179 }
 0x394   : > { %v1184_v42 = vsub.f32 %v1126_v14, %v1180_v28 }
 0x396   : > { %v1186_v45 = vmul.f32 1.442695, %v1184_v42 }
 0x397   : > { %v1183_v46 = vpop.xlane.xlu1 %1182 }
 0x398   : > { %1870 = vpow2.f32 %v1186_v45  ;;  %v1185_v47 = vsub.f32 %v1172_v19, %v1183_v46  ;;  %v1444_v19 = vshrl.u32 %v1443_v18, 15 }
 0x39a   : > { %v1188_v50 = vmul.f32 1.442695, %v1185_v47  ;;  %v1445_v20 = vxor.u32 %v1444_v19, %v1443_v18 }
 0x39c   : > { %1872 = vpow2.f32 %v1188_v50  ;;  %v1446_v21 = vmul.u32 2146121005, %v1445_v20 }
 0x39e   : > { %v1447_v25 = vshrl.u32 %v1446_v21, 16 }
 0x3a0   : > { %v1448_v36 = vxor.u32 %v1447_v25, %v1446_v21 }
 0x3a2   : > { %v1871_v54 = vpop.eup %1870  ;;  %vm1449_vm7 = vcmp.ge.u32.totalorder %v1448_v36, 429496729 }
 0x3a3   : > { %v1190_v55 = vsel %vm1177_vm4, %v1871_v54, 0.0  ;;  %v1224_v56 = vsel %vm1222_vm5, %v1871_v54, 0.0 }
 0x3a4   : > { %1191 = vadd.xlane.f32.xlu1 %v1190_v55  ;;  %v1228_v22 = vpack.c.bf16 %v1224_v56, %v1224_v56  ;;  %v1672_v55 = vld [vmem:[%s2728_s11] ss:$0 sm:$0xff] }
 0x3a6   : > { %v1873_v57 = vpop.eup %1872  ;;  %1737 = vmatmul.mubr.msk.bf16.vlgmr.msra.gmra.mrb[8].mxu1 %vm1177_vm4, %v1228_v22 }
 0x3a7   : > { %v1193_v58 = vsel %vm1177_vm4, %v1873_v57, 0.0  ;;  %v1225_v59 = vsel %vm1223_vm6, %v1873_v57, 0.0  ;;  %1748 = vmatprep.mubr.msk.bf16.mxu1 %vm2139_vm0, %v2138_v0  ;;  %1747 = vmatpush3.bf16.msra.mxu1 %v1868_v61 }
 0x3a8   : > { %1194 = vadd.xlane.f32.xlu0 %v1193_v58  ;;  %v1229_v60 = vpack.c.bf16 %v1225_v59, %v1225_v59 }
 0x3aa   : > { %1743 = vmatmul.mubr.msk.bf16.vlgmr.msra.gmra.mrb[12].mxu0 %vm1177_vm4, %v1229_v60 }
 0x3ab   : > { %1754 = vmatprep.mubr.msk.bf16.mxu0 %vm2139_vm0, %v2138_v0  ;;  %1753 = vmatpush3.bf16.msra.mxu0 %v1869_v62 }
 0x431   : > { %v1192_v63 = vpop.xlane.xlu1 %1191 }
 0x432   : > { %1874 = vrcp.f32 %v1192_v63 }
 0x435   : > { %v1195_v1 = vpop.xlane.xlu0 %1194 }
 0x436   : > { %1876 = vrcp.f32 %v1195_v1 }
 0x43c   : > { %v1875_v2 = vpop.eup %1874 }
 0x43d   : > { %v1226_v3 = vmul.f32 1.1111112, %v1875_v2 }
 0x440   : > { %v1877_v5 = vpop.eup %1876 }
 0x441   : > { %v1227_v11 = vmul.f32 1.1111112, %v1877_v5 }
 0x479   : > { %v1271_v6 = vpop.f32.mrb[8].mxu1 }
 0x47a   : > { %v1323_v0 = vmul.f32 %v1271_v6, %v1226_v3  ;;  %v1738_v7 = vpop.f32.mrb[9].mxu1 }
 0x47b   : > { %v1274_v8 = vpop.f32.mrb[10].mxu1 }
 0x47c   : > { %v1325_v9 = vpack.c.bf16 %v1323_v0, %v1323_v0  ;;  %v1739_v10 = vpop.f32.mrb[11].mxu1 }
 0x47d   : > { %v1317_v12 = vpop.f32.mrb[12].mxu0 }
 0x47e   : > { %v1324_v33 = vmul.f32 %v1317_v12, %v1227_v11  ;;  %v1744_v38 = vpop.f32.mrb[13].mxu0  ;;  %1749 = vmatmul.mubr.msk.bf16.vlgmr.msra.gmra.mrb[12].mxu1 %vm1084_vm2, %v1325_v9 }
 0x47f   : > { %v1320_v13 = vpop.f32.mrb[14].mxu0 }
 0x480   : > { %v1326_v14 = vpack.c.bf16 %v1324_v33, %v1324_v33  ;;  %v1745_v15 = vpop.f32.mrb[15].mxu0 }
 0x482   : > { %1755 = vmatmul.mubr.msk.bf16.vlgmr.msra.gmra.mrb[16].mxu0 %vm1084_vm2, %v1326_v14 }
 0x551   : > { %v1374_v23 = vpop.f32.mrb[12].mxu1 }
 0x552   : > { %v1750_v24 = vpop.f32.mrb[13].mxu1  ;;  %v1429_v34 = vsel %vm541_vm1, %v1374_v23, 0.0 }
 0x553   : > { %v1377_v27 = vpop.f32.mrb[14].mxu1 }
 0x554   : > { %v1751_v29 = vpop.f32.mrb[15].mxu1 }
 0x555   : > { %v1423_v31 = vpop.f32.mrb[16].mxu0 }
 0x556   : > { %v1430_v35 = vsel %vm541_vm1, %v1423_v31, 0.0  ;;  %v1756_v26 = vpop.f32.mrb[17].mxu0 }
 0x557   : > { %v1431_v32 = vadd.f32 %v1430_v35, %v1429_v34  ;;  %v1426_v37 = vpop.f32.mrb[18].mxu0 }
 0x558   : > { %v1757_v39 = vpop.f32.mrb[19].mxu0 }
 0x559   : > { %v1439_v40 = vadd.f32 %v1670_v30, %v1431_v32 }
 0x55b   : > { %v1450_v28 = vmul.f32 1.1111112, %v1439_v40 }
 0x55d   : > { %v1451_v42 = vsel %vm1449_vm7, %v1450_v28, 0.0 }
 0x55e   : > { %v1452_v43 = vadd.f32 %v1451_v42, %v517_v41 }
 0x560   : > { %v1453_v44 = vsel %vm541_vm1, %v1452_v43, 0.0 }
 0x561   : > { %1454 = vadd.xlane.f32.xlu1 %v1453_v44 }
 0x5ee   : > { %v1455_v45 = vpop.xlane.xlu1 %1454 }
 0x5ef   : > { %v1457_v46 = vmul.f32 0.03125, %v1455_v45 }
 0x5f1   : > { %v1458_v47 = vsub.f32 %v1452_v43, %v1457_v46 }
 0x5f3   : > { %v1459_v48 = vmul.f32 %v1458_v47, %v1458_v47 }
 0x5f5   : > { %v1460_v49 = vsel %vm541_vm1, %v1459_v48, 0.0 }
 0x5f6   : > { %1461 = vadd.xlane.f32.xlu1 %v1460_v49 }
 0x683   : > { %v1462_v50 = vpop.xlane.xlu1 %1461 }
 0x684   : > { %v1463_v51 = vmul.f32 0.03125, %v1462_v50 }
 0x686   : > { %v1464_v4 = vadd.f32 1e-12, %v1463_v51 }
 0x688   : > { %1878 = vrsqrt.f32 %v1464_v4 }
 0x692   : > { %v1879_v52 = vpop.eup %1878 }
 0x693   : > { %v1466_v54 = vmul.f32 %v1879_v52, %v1458_v47 }
 0x695   : > { %v1474_v56 = vmul.f32 %v1671_v53, %v1466_v54 }
 0x697   : > { %v1482_v22 = vadd.f32 %v1672_v55, %v1474_v56 }
 0x699   : > { %1483 = vst.msk [vmem:[%s508_s23] sm:$0xff] %vm541_vm1, %v1482_v22 }
 0x69a   : > { %2063 = shalt.err (!%p2060_p6)
}
 0x69b   : > { %s2064_s13 = scalar_lea.hbm %s2638_s2, 128  ;;  %s2068_s11 = scalar_lea.hbm %s2729_s1, 256 }
 0x69c   : > { %p2065_p10 = scmp.ne.s32.totalorder %s2638_s2, %s2064_s13  ;;  %p2069_p5 = scmp.lt.u32.totalorder %s2638_s2, %s2729_s1 }
 0x69d   : > { %p2070_p9 = scmp.lt.u32.totalorder %s2068_s11, %s2064_s13  ;;  %p2072_p4 = scmp.lt.u32.totalorder %s2064_s13, %s2638_s2 }
 0x69e   : > { %p2066_p11 = pnand %p2065_p10, %p2730_p12 }
 0x69f   : > { %p2071_p7 = por %p2070_p9, %p2069_p5 }
 0x6a0   : > { %p2067_p8 = pneg %p2066_p11 }
 0x6a1   : > { %p2073_p1 = por %p2072_p4, %p2071_p7 }
 0x6a3   : > { %p2074_p13 = pnand %p2073_p1, %p2067_p8 }
 0x6a5   : > { %2077 = shalt.err (!%p2074_p13)
}
 0x6a6   : > { %1780 = dma.vmem_to_hbm [thread:$0]  (%p2730_p12), %s2640_s12, 128, %s2638_s2, %s1485_s25  }
 0x6a7 PF: > { %s1510_s18 = sand.u32 1, %s2116_s27   ;;  %p2731_p0 = scmp.ne.s32.totalorder %s2715_s14, 0 }
 0x6a8   : > { %p2732_p2 = scmp.ge.s32.totalorder %s2128_s30, 2  ;;  %s1511_s21 = scalar_lea.sflag [#allocation6], %s1510_s18 }
 0x6aa   : > { %p1803_p3 = pnand %p2732_p2, %p2731_p0 }
 0x6ac   : > { %2111 = dma.done.wait (!%p1803_p3), %s1511_s21, 128  }
 0x6ad   : > { %2113 = vsyncadd (!%p1803_p3), %s1511_s21, 4294967168  ;;  %p30_p6 = scmp.ge.s32.totalorder %s2383_s19, 4   ;;  %s2733_s27 = smov %s2120_s28 }
 0x6ae   : > { %s2734_s28 = smov %s2124_s29  ;;  %s2735_s29 = smov %s2395_s26 }
 0x6af   : > { %s2736_s30 = smov %s2383_s19  ;;  %32 = sbr.rel (!%p30_p6) target bundleno = 16 (0x10), region = 136 }
 0x6b6   :  { %1516 = vsyncpa [#allocation5], 1 }
 0x6b7   :  { %1518 = vsyncpa [#allocation5 + $0x1], 1 }
 0x6b8   :  { %1519 = vsyncpa [#allocation8], 1 }
 0x6b9   :  { %1520 = vsyncpa [#allocation11], 1 }
 0x6ba   :  { %1521 = vsyncpa [#allocation14], 1 }
 0x6bb   :  { %1522 = vsyncpa [#allocation6], 1 }
 0x6bc   :  { %1524 = vsyncpa [#allocation6 + $0x1], 1 }

// kernel: tpu_custom_call.1
= control target key start
LH: loop header
LB: loop body
LE: loop exit
PB: predicated region body
PF: predicated region fallthrough
CT: control target
= control target key end

     0   :  { %s2683_s0 = inlined_call_operand.<no memory space> [shape: s32[1], index: 0, kind: input, shape index: {}]   ;;  %s2684_s1 = inlined_call_operand.hbm [shape: bf16[2,8,32], index: 1, kind: input, shape index: {}]   ;;  %s2685_s2 = inlined_call_operand.vmem [shape: f32[2,1,8], index: 2, kind: input, shape index: {}]   ;;  %s2686_s3 = inlined_call_operand.hbm [shape: bf16[32,32], index: 3, kind: input, shape index: {}]   ;;  %s2687_s4 = inlined_call_operand.hbm [shape: f32[1,32], index: 4, kind: input, shape index: {}]   ;;  %s2688_s5 = inlined_call_operand.vmem [shape: bf16[32,32], index: 5, kind: input, shape index: {}]   ;;  %s2689_s6 = inlined_call_operand.hbm [shape: f32[1,32], index: 6, kind: input, shape index: {}]   ;;  %s2690_s7 = inlined_call_operand.hbm [shape: bf16[32,32], index: 7, kind: input, shape index: {}]   ;;  %s2691_s8 = inlined_call_operand.hbm [shape: f32[1,32], index: 8, kind: input, shape index: {}]   ;;  %s2692_s9 = inlined_call_operand.vmem [shape: bf16[2,16,32], index: 9, kind: input, shape index: {}]   ;;  %s2693_s10 = inlined_call_operand.vmem [shape: f32[1,32], index: 10, kind: input, shape index: {}]   ;;  %s2694_s11 = inlined_call_operand.vmem [shape: f32[1,32], index: 11, kind: input, shape index: {}]   ;;  %s2695_s12 = inlined_call_operand.vmem [shape: f32[1,32], index: 12, kind: input, shape index: {}]   ;;  %s2696_s13 = inlined_call_operand.hbm [shape: f32[2,8,32], index: 13, kind: output, shape index: {}]  }
   0x1   :  { %2702 = sst [smem:[#allocation21_spill]] %s2684_s1 }
   0x2   :  { %2703 = sst [smem:[#allocation22_spill]] %s2685_s2 }
   0x3   :  { %2704 = sst [smem:[#allocation23_spill]] %s2693_s10 }
   0x4   :  { %2705 = sst [smem:[#allocation24_spill]] %s2694_s11 }
   0x5   :  { %2706 = sst [smem:[#allocation25_spill]] %s2695_s12 }
   0x6   :  { %2707 = sst [smem:[#allocation26_spill]] %s2696_s13 }
   0x7   :  { %18 = sst [smem:[#allocation3]] %s2683_s0 }
   0x8   :  { %19 = vsyncpa [#allocation5], 0 }
   0x9   :  { %21 = vsyncpa [#allocation5 + $0x1], 0 }
   0xa   :  { %22 = vsyncpa [#allocation8], 0 }
   0xb   :  { %23 = vsyncpa [#allocation11], 0 }
   0xc   :  { %24 = vsyncpa [#allocation14], 0 }
   0xd   :  { %25 = vsyncpa [#allocation6], 0 }
   0xe   :  { %27 = vsyncpa [#allocation6 + $0x1], 0  ;;  %s2217_s27 = smov 0   ;;  %s2219_s28 = smov 0  }
   0xf   :  { %s2221_s29 = smov 0   ;;  %s2223_s30 = smov 0  }
  0x10 LB: > { %s2130_s0 = smov [#allocation7]   ;;  %s2238_s15 = sadd.s32 4294967295, %s2128_s30   ;;  %s2128_s30 = sphi %s2223_s30, %s2736_s30   ;;  %s2124_s29 = sphi %s2221_s29, %s2735_s29   ;;  %s2120_s28 = sphi %s2219_s28, %s2734_s28   ;;  %s2116_s27 = sphi %s2217_s27, %s2733_s27  }
  0x11   : > { %s338_s14 = sshll.u32 %s2130_s0, 4  ;;  %p1626_p0 = scmp.ge.s32.totalorder %s2128_s30, 1  ;;  %s2243_s14 = int_to_ptr.vmem [resolvable:$true] %s338_s14 }
  0x12   : > { %p2699_p1 = scmp.eq.s32.totalorder %s2238_s15, 0  ;;  %p326_p2 = scmp.lt.s32.totalorder %s2128_s30, 3 }
  0x13   : > { %s2131_s17 = smov [#allocation10]   ;;  %s2132_s20 = smov [#allocation9]  }
  0x14   : > { %p2245_p3 = pnand %p1626_p0, %p326_p2  ;;  %s366_s18 = sshll.u32 %s2131_s17, 4  ;;  %s2258_s18 = int_to_ptr.vmem [resolvable:$true] %s366_s18 }
  0x15   : > { %s352_s21 = sshll.u32 %s2132_s20, 4  ;;  %s1880_s24 = scalar_lea.hbm %s2686_s3, 256  ;;  %s2260_s21 = int_to_ptr.vmem [resolvable:$true] %s352_s21 }
  0x16   : > { %s2708_s16 = scalar_select %p2245_p3, 1, 0 }
  0x17   : > { %p1782_p5 = pneg %p2245_p3  ;;  %p1881_p7 = scmp.ne.s32.totalorder %s2686_s3, %s1880_s24 }
  0x18   : > { %p1887_p11 = scmp.lt.u32.totalorder %s1880_s24, %s2686_s3 }
  0x19   : > { %p2254_p6 = pnand %p1782_p5, %p2699_p1 }
  0x1b   : > { %p2270_p8 = pneg %p2254_p6 }
  0x1d   : > { %p1883_p9 = pnand %p2270_p8, %p1881_p7 }
  0x1f   : > { %p1884_p10 = pneg %p1883_p9 }
  0x21   : > { %p1889_p12 = pnand %p1887_p11, %p1884_p10 }
  0x23   : > { %1892 = shalt.err (!%p1889_p12)
}
  0x24   : > { %s1893_s22 = scalar_lea.vmem %s2243_s14, 256  ;;  %p1901_p5 = scmp.lt.s32.totalorder %s2243_s14, %s2243_s14 }
  0x25   : > { %p1894_p13 = scmp.ne.s32.totalorder %s2243_s14, %s1893_s22  ;;  %p1902_p4 = scmp.lt.s32.totalorder %s1893_s22, %s1893_s22 }
  0x27   : > { %p1896_p0 = pnand %p1894_p13, %p2270_p8  ;;  %p1903_p7 = por %p1902_p4, %p1901_p5 }
  0x29   : > { %p1897_p2 = pneg %p1896_p0 }
  0x2b   : > { %p1904_p9 = pnand %p1903_p7, %p1897_p2 }
  0x2d   : > { %1907 = shalt.err (!%p1904_p9)
}
  0x2e   : > { %s2698_s23 = smov 64   ;;  %s2134_s24 = smov 4  }
  0x2f   : > { %1785 = dma.hbm_to_vmem [thread:$0]  (!%p2254_p6), %s2686_s3, 256, %s2243_s14, [#allocation8], %s2698_s23, %s2698_s23, %s2134_s24  }
  0x30   : > { %s1908_s22 = scalar_lea.hbm %s2689_s6, 16 }
  0x31   : > { %p1909_p4 = scmp.ne.s32.totalorder %s2689_s6, %s1908_s22  ;;  %p1915_p12 = scmp.lt.u32.totalorder %s1908_s22, %s2689_s6 }
  0x33   : > { %p1911_p10 = pnand %p1909_p4, %p2270_p8 }
  0x35   : > { %p1912_p11 = pneg %p1911_p10 }
  0x37   : > { %p1917_p13 = pnand %p1915_p12, %p1912_p11 }
  0x39   : > { %1920 = shalt.err (!%p1917_p13)
}
  0x3a   : > { %s1921_s14 = scalar_lea.vmem %s2258_s18, 16  ;;  %s1928_s12 = scalar_lea.vmem %s2258_s18, 32 }
  0x3b   : > { %p1922_p0 = scmp.ne.s32.totalorder %s2258_s18, %s1921_s14  ;;  %p1929_p7 = scmp.lt.s32.totalorder %s2258_s18, %s2258_s18 }
  0x3c   : > { %p1930_p9 = scmp.lt.s32.totalorder %s1928_s12, %s1921_s14 }
  0x3d   : > { %p1924_p2 = pnand %p1922_p0, %p2270_p8 }
  0x3e   : > { %p1931_p4 = por %p1930_p9, %p1929_p7 }
  0x3f   : > { %p1925_p5 = pneg %p1924_p2 }
  0x41   : > { %p1932_p10 = pnand %p1931_p4, %p1925_p5 }
  0x43   : > { %1935 = shalt.err (!%p1932_p10)
}
  0x44   : > { %1791 = dma.hbm_to_vmem [thread:$0]  (!%p2254_p6), %s2689_s6, 16, %s2258_s18, [#allocation11]  }
  0x45   : > { %s1936_s26 = scalar_lea.hbm %s2687_s4, 16 }
  0x46   : > { %p1937_p11 = scmp.ne.s32.totalorder %s2687_s4, %s1936_s26  ;;  %p1943_p0 = scmp.lt.u32.totalorder %s1936_s26, %s2687_s4 }
  0x48   : > { %p1939_p12 = pnand %p1937_p11, %p2270_p8 }
  0x4a   : > { %p1940_p13 = pneg %p1939_p12 }
  0x4c   : > { %p1945_p2 = pnand %p1943_p0, %p1940_p13 }
  0x4e   : > { %1948 = shalt.err (!%p1945_p2)
}
  0x4f   : > { %s1949_s18 = scalar_lea.vmem %s2260_s21, 16  ;;  %s1956_s12 = scalar_lea.vmem %s2260_s21, 32 }
  0x50   : > { %p1950_p5 = scmp.ne.s32.totalorder %s2260_s21, %s1949_s18  ;;  %p1957_p4 = scmp.lt.s32.totalorder %s2260_s21, %s2260_s21 }
  0x51   : > { %p1958_p10 = scmp.lt.s32.totalorder %s1956_s12, %s1949_s18 }
  0x52   : > { %p1952_p7 = pnand %p1950_p5, %p2270_p8 }
  0x53   : > { %p1959_p11 = por %p1958_p10, %p1957_p4 }
  0x54   : > { %p1953_p9 = pneg %p1952_p7 }
  0x56   : > { %p1960_p12 = pnand %p1959_p11, %p1953_p9 }
  0x58   : > { %1963 = shalt.err (!%p1960_p12)
}
  0x59   : > { %1788 = dma.hbm_to_vmem [thread:$0]  (!%p2254_p6), %s2687_s4, 16, %s2260_s21, [#allocation8]  }
  0x5a   : > { %s2135_s13 = smov [#allocation12]   ;;  %s2136_s26 = smov [#allocation13]  }
  0x5b   : > { %s376_s25 = sshll.u32 %s2135_s13, 4  ;;  %s390_s17 = sshll.u32 %s2136_s26, 4  ;;  %s377_s25 = int_to_ptr.vmem [resolvable:$true] %s376_s25  ;;  %s391_s17 = int_to_ptr.vmem [resolvable:$true] %s390_s17 }
  0x5c   : > { %s1964_s14 = scalar_lea.hbm %s2690_s7, 256 }
  0x5d   : > { %p1965_p13 = scmp.ne.s32.totalorder %s2690_s7, %s1964_s14  ;;  %p1971_p5 = scmp.lt.u32.totalorder %s1964_s14, %s2690_s7 }
  0x5f   : > { %p1967_p0 = pnand %p1965_p13, %p2270_p8 }
  0x61   : > { %p1968_p2 = pneg %p1967_p0 }
  0x63   : > { %p1973_p7 = pnand %p1971_p5, %p1968_p2 }
  0x65   : > { %1976 = shalt.err (!%p1973_p7)
}
  0x66   : > { %s1977_s21 = scalar_lea.vmem %s377_s25, 256  ;;  %p1985_p11 = scmp.lt.s32.totalorder %s377_s25, %s377_s25 }
  0x67   : > { %p1978_p9 = scmp.ne.s32.totalorder %s377_s25, %s1977_s21  ;;  %p1986_p12 = scmp.lt.s32.totalorder %s1977_s21, %s1977_s21 }
  0x69   : > { %p1980_p4 = pnand %p1978_p9, %p2270_p8  ;;  %p1987_p1 = por %p1986_p12, %p1985_p11 }
  0x6b   : > { %p1981_p10 = pneg %p1980_p4 }
  0x6d   : > { %p1988_p3 = pnand %p1987_p1, %p1981_p10 }
  0x6f   : > { %1991 = shalt.err (!%p1988_p3)
}
  0x70   : > { %s2711_s11 = smov 64   ;;  %s1992_s22 = scalar_lea.hbm %s2691_s8, 16 }
  0x71   : > { %1794 = dma.hbm_to_vmem [thread:$0]  (!%p2254_p6), %s2690_s7, 256, %s377_s25, [#allocation11], %s2711_s11, %s2711_s11, %s2134_s24  }
  0x72   : > { %p1993_p1 = scmp.ne.s32.totalorder %s2691_s8, %s1992_s22  ;;  %p1999_p0 = scmp.lt.u32.totalorder %s1992_s22, %s2691_s8 }
  0x74   : > { %p1995_p3 = pnand %p1993_p1, %p2270_p8 }
  0x76   : > { %p1996_p13 = pneg %p1995_p3 }
  0x78   : > { %p2001_p2 = pnand %p1999_p0, %p1996_p13 }
  0x7a   : > { %2004 = shalt.err (!%p2001_p2)
}
  0x7b   : > { %s2005_s21 = scalar_lea.vmem %s391_s17, 16  ;;  %s2012_s24 = scalar_lea.vmem %s391_s17, 32 }
  0x7c   : > { %p2006_p5 = scmp.ne.s32.totalorder %s391_s17, %s2005_s21  ;;  %p2013_p4 = scmp.lt.s32.totalorder %s391_s17, %s391_s17 }
  0x7d   : > { %p2014_p10 = scmp.lt.s32.totalorder %s2012_s24, %s2005_s21 }
  0x7e   : > { %p2008_p7 = pnand %p2006_p5, %p2270_p8 }
  0x7f   : > { %p2015_p11 = por %p2014_p10, %p2013_p4 }
  0x80   : > { %p2009_p9 = pneg %p2008_p7 }
  0x82   : > { %p2016_p12 = pnand %p2015_p11, %p2009_p9 }
  0x84   : > { %2019 = shalt.err (!%p2016_p12)
}
  0x85   : > { %1797 = dma.hbm_to_vmem [thread:$0]  (!%p2254_p6), %s2691_s8, 16, %s391_s17, [#allocation14]  }
  0x86   : > { %s1625_s0 = sadd.s32 4294967294, %s2128_s30   ;;  %s2383_s19 = sadd.s32 1, %s2128_s30  }
  0x87   : > { %s40_s23 = sadd.s32 1, %s2124_s29  ;;  %s37_s13 = ssub.s32 %s2128_s30, %s2383_s19 }
  0x88   : > { %p47_p8 = scmp.ne.s32.totalorder %s2124_s29, %s2120_s28  ;;  %p38_p1 = scmp.eq.s32.totalorder %s37_s13, 0 }
  0x89   : > { %p48_p3 = scmp.eq.s32.totalorder %s2128_s30, 0  ;;  %p53_p13 = scmp.ne.s32.totalorder %s2120_s28, %s2116_s27 }
  0x8a   : > { %p313_p0 = scmp.eq.s32.totalorder %s2238_s15, 1  ;;  %p2712_p5 = scmp.eq.s32.totalorder %s2238_s15, 0 }
  0x8b   : > { %s2395_s26 = scalar_select %p38_p1, %s2124_s29, %s40_s23  }
  0x8c   : > { %p49_p2 = por %p48_p3, %p47_p8  ;;  %p2399_p7 = por %p2712_p5, %p53_p13 }
  0x8d   : > { %p2403_p6 = por %p313_p0, %p47_p8  ;;  %p319_p9 = scmp.eq.s32.totalorder %s1625_s0, 1 }
  0x8e   : > { %p1811_p4 = scmp.lt.s32.totalorder %s2128_s30, 2  ;;  %s413_s22 = sand.u32 1, %s2124_s29  }
  0x8f   : > { %s2714_s17 = scalar_select %p2403_p6, 1, 0 }
  0x90   : > { %p2409_p10 = por %p319_p9, %p53_p13  ;;  %s1633_s18 = sshll.u32 %s413_s22, 2 }
  0x91   : > { %s1634_s12 = sshll.u32 %s2128_s30, 6  ;;  %s2716_s1 = sld [smem:[#allocation21_spill]] }
  0x92   : > { %s2715_s14 = scalar_select %p2409_p10, 1, 0 }
  0x93   : > { %s417_s25 = scalar_lea.vmem [#allocation4], %s1633_s18  ;;  %p2419_p11 = pnand %p1811_p4, %p49_p2 }
  0x94   : > { %s424_s11 = sshll.u32 %s417_s25, 4  ;;  %s414_s23 = scalar_lea.sflag [#allocation5], %s413_s22  ;;  %s2423_s11 = int_to_ptr.vmem [resolvable:$true] %s424_s11 }
  0x95   : > { %p2022_p8 = pneg %p2419_p11 }
  0x97   : > { %s2417_s24 = scalar_lea.hbm %s2716_s1, %s1634_s12  ;;  %s2025_s10 = scalar_lea.hbm %s2716_s1, 128 }
  0x98   : > { %s2020_s13 = scalar_lea.hbm %s2417_s24, 64  ;;  %p2026_p13 = scmp.lt.u32.totalorder %s2417_s24, %s2716_s1 }
  0x99   : > { %p2021_p12 = scmp.ne.s32.totalorder %s2417_s24, %s2020_s13  ;;  %p2027_p0 = scmp.lt.u32.totalorder %s2025_s10, %s2020_s13 }
  0x9a   : > { %p2029_p5 = scmp.lt.u32.totalorder %s2020_s13, %s2417_s24 }
  0x9b   : > { %p2023_p1 = pnand %p2022_p8, %p2021_p12  ;;  %p2028_p2 = por %p2027_p0, %p2026_p13 }
  0x9d   : > { %p2024_p3 = pneg %p2023_p1  ;;  %p2030_p9 = por %p2029_p5, %p2028_p2 }
  0x9f   : > { %p2031_p4 = pnand %p2030_p9, %p2024_p3 }
  0xa1   : > { %2034 = shalt.err (!%p2031_p4)
}
  0xa2   : > { %s2035_s22 = scalar_lea.vmem %s2423_s11, 64  ;;  %s2137_s12 = smov [#allocation4]  }
  0xa3   : > { %p2036_p12 = scmp.ne.s32.totalorder %s2423_s11, %s2035_s22  ;;  %s2040_s18 = sshll.u32 %s2137_s12, 4  ;;  %s2041_s18 = int_to_ptr.vmem [resolvable:$false] %s2040_s18 }
  0xa4   : > { %s2042_s21 = scalar_lea.vmem %s2041_s18, 128  ;;  %p2043_p6 = scmp.lt.s32.totalorder %s2423_s11, %s2041_s18 }
  0xa5   : > { %p2038_p1 = pnand %p2036_p12, %p2022_p8  ;;  %p2044_p13 = scmp.lt.s32.totalorder %s2042_s21, %s2035_s22 }
  0xa7   : > { %p2039_p10 = pneg %p2038_p1  ;;  %p2045_p0 = por %p2044_p13, %p2043_p6 }
  0xa9   : > { %p2046_p2 = pnand %p2045_p0, %p2039_p10 }
  0xab   : > { %2049 = shalt.err (!%p2046_p2)
}
  0xac   : > { %1801 = dma.hbm_to_vmem [thread:$0]  (!%p2419_p11), %s2417_s24, 64, %s2423_s11, %s414_s23  }
  0xad   : > { %p2718_p3 = scmp.ne.s32.totalorder %s2708_s16, 0 }
  0xae   : > { %s2453_s13 = sand.u32 (!%p2718_p3), 1, %s2120_s28  }
  0xaf   : > { %439 = sbr.rel (%p2718_p3) target bundleno = 1703 (0x6a7), region = 68  ;;  %s1636_s10 = sshll.u32 (!%p2718_p3), %s2453_s13, 2 }
  0xb0   : > { %s442_s25 = scalar_lea.sflag (!%p2718_p3), [#allocation5], %s2453_s13  ;;  %s445_s22 = scalar_lea.vmem (!%p2718_p3), [#allocation4], %s1636_s10 }
  0xb6   : > { %2095 = dma.done.wait (%p2399_p7), %s442_s25, 64  }
  0xb7   : > { %2097 = vsyncadd (%p2399_p7), %s442_s25, 4294967232  ;;  %p2719_p6 = scmp.eq.s32.totalorder %s2238_s15, 0 }
  0xb9   : > { %2099 = dma.done.wait (%p2719_p6), [#allocation8], 272   ;;  %p2720_p10 = pmov %p2719_p6 }
  0xba   : > { %p2721_p11 = pmov %p2719_p6 }
  0xbb   : > { %2101 = vsyncadd (%p2720_p10), [#allocation8], 4294967024 }
  0xbc   : > { %2103 = dma.done.wait (%p2721_p11), [#allocation11], 272   ;;  %p2722_p8 = pmov %p2719_p6 }
  0xbd   : > { %p2723_p5 = pmov %p2719_p6 }
  0xbe   : > { %2105 = vsyncadd (%p2722_p8), [#allocation11], 4294967024 }
  0xbf   : > { %2107 = dma.done.wait (%p2723_p5), [#allocation14], 16   ;;  %p2724_p9 = pmov %p2723_p5 }
  0xc0   : > { %v2138_v0 = vmov 0.0   ;;  %vm2139_vm0 = vmmov 0   ;;  %v1862_v1 = vld [vmem:[%s2688_s5] sm:$0xff]   ;;  %v1863_v2 = vld [vmem:[#allocation7] sm:$0xff]   ;;  %vm541_vm1 = vcmask 261120   ;;  %v1865_v5 = vld [vmem:[#allocation7 + $0x8] sm:$0xff]   ;;  %v719_v28 = vlaneseq }
  0xc1   : > { %2109 = vsyncadd (%p2724_p9), [#allocation14], 4294967280  ;;  %1706 = vmatprep.subr.bf16.mxu1 %v2138_v0  ;;  %1698 = vmatprep.subr.bf16.mxu0 %v2138_v0  ;;  %v1864_v3 = vld [vmem:[%s2688_s5 + $0x8] sm:$0xff]   ;;  %v2487_v4 = vld [vmem:[%s445_s22] sm:$0xf]  ;;  %s2140_s0 = smov 112  }
  0xc2   : > { %1710 = vmatprep.mubr.msk.bf16.mxu1 %vm2139_vm0, %v2138_v0  ;;  %1702 = vmatprep.mubr.msk.bf16.mxu0 %vm2139_vm0, %v2138_v0  ;;  %v1866_v6 = vld [vmem:[#allocation12] sm:$0xff]   ;;  %v1867_v7 = vld [vmem:[#allocation12 + $0x8] sm:$0xff]   ;;  %v1647_v8 = vld [vmem:[#allocation10] ss:$0 sm:$0xff]  ;;  %v2141_v26 = vmov 1983009808  }
  0xc3   : > { %1707 = vmatpush3.bf16.msra.mxu1 %v1862_v1  ;;  %1699 = vmatpush3.bf16.msra.mxu0 %v1863_v2  ;;  %v1643_v10 = vld [vmem:[#allocation9] ss:$0 sm:$0xff]  ;;  %v1651_v20 = vld [vmem:[#allocation13] ss:$0 sm:$0xff]  ;;  %v717_v27 = vunpack.c.l.s4 %v2141_v26  ;;  %v2509_v30 = vshrl.u32 %v719_v28, 7  ;;  %vm1084_vm2 = vcmask 130048  }
  0xc4   : > { %1708 = vmatprep.subr.bf16.mxu1 %v2138_v0  ;;  %1700 = vmatprep.subr.bf16.mxu0 %v2138_v0  ;;  %v2142_v31 = vmov 1934713408   ;;  %vm1233_vm3 = vcmask 1043456   ;;  %p509_p7 = scmp.lt.s32.totalorder %s2238_s15, 1  ;;  %s2725_s2 = sld [smem:[#allocation22_spill]]  ;;  %vm1177_vm4 = vcmask 64512  }
  0xc5   : > { %v718_v29 = vunpack.c.0.s8 %v717_v27  ;;  %v748_v32 = vunpack.c.l.s4 %v2142_v31  ;;  %s513_s10 = sld [smem:[#allocation3]]  ;;  %s514_s25 = smul.u32 2654435769, %s2238_s15 }
  0xc6   : > { %s510_s23 = scalar_select %p509_p7, %s2238_s15, 1 }
  0xc7   : > { %1709 = vmatpush3.bf16.msra.mxu1 %v1864_v3  ;;  %1701 = vmatpush3.bf16.msra.mxu0 %v1865_v5  ;;  %v2512_v33 = vsub.s32 %v718_v29, %v2509_v30  ;;  %v749_v34 = vunpack.c.0.s8 %v748_v32  ;;  %s2728_s11 = sld [smem:[#allocation25_spill]]  ;;  %s2729_s1 = sld [smem:[#allocation26_spill]] }
  0xc8   : > { %1722 = vmatprep.subr.bf16.mxu1 %v2138_v0  ;;  %1714 = vmatprep.subr.bf16.mxu0 %v2138_v0  ;;  %p2730_p12 = scmp.ne.s32.totalorder %s2714_s17, 0 }
  0xc9   : > { %v2517_v38 = vsub.s32 %v749_v34, %v2509_v30 }
  0xca   : > { %1711 = vmatmul.mubr.msk.bf16.vlgmr.msra.gmra.mrb[0].mxu1 %vm541_vm1, %v2487_v4  ;;  %1703 = vmatmul.mubr.msk.bf16.vlgmr.msra.gmra.mrb[0].mxu0 %vm541_vm1, %v2487_v4  ;;  %s511_s21 = scalar_lea.vmem %s2725_s2, %s510_s23 }
  0xcb   : > { %1724 = vmatprep.mubr.msk.bf16.mxu1 %vm2139_vm0, %v2138_v0  ;;  %1718 = vmatprep.mubr.msk.bf16.mxu0 %vm2139_vm0, %v2138_v0  ;;  %s2587_s22 = sxor.u32 %s514_s25, %s513_s10  ;;  %s1642_s10 = sshll.u32 %s2453_s13, 3 }
  0xcc   : > { %1715 = vmatpush3.bf16.msra.mxu0 %v1866_v6  ;;  %s1203_s16 = sadd.s32 1187967562, %s2587_s22  ;;  %s1440_s23 = sadd.s32 1463923124, %s2587_s22 }
  0xcd   : > { %1716 = vmatprep.subr.bf16.mxu0 %v2138_v0  ;;  %s1485_s25 = scalar_lea.sflag [#allocation6], %s2453_s13 }
  0xd0   : > { %1717 = vmatpush3.bf16.msra.mxu0 %v1867_v7 }
  0xd1   : > { %1728 = vmatprep.subr.bf16.mxu0 %v2138_v0 }
  0xd3   : > { %1719 = vmatmul.mubr.msk.bf16.vlgmr.msra.gmra.mrb[4].mxu0 %vm541_vm1, %v2487_v4 }
  0xd4   : > { %1730 = vmatprep.mubr.msk.bf16.mxu0 %vm2139_vm0, %v2138_v0 }
 0x19d   : > { %v642_v9 = vpop.f32.mrb[0].mxu1  ;;  %v579_v13 = vpop.f32.mrb[0].mxu0 }
 0x19e   : > { %v643_v11 = vadd.f32 %v1647_v8, %v642_v9  ;;  %v1712_v12 = vpop.f32.mrb[1].mxu1  ;;  %v1704_v15 = vpop.f32.mrb[1].mxu0  ;;  %v580_v17 = vadd.f32 %v1643_v10, %v579_v13 }
 0x19f   : > { %v645_v14 = vpop.f32.mrb[2].mxu1  ;;  %v582_v18 = vpop.f32.mrb[2].mxu0 }
 0x1a0   : > { %834 = vrot.lane.b32.xlu0 %v643_v11, %s2140_s0  ;;  %v1713_v16 = vpop.f32.mrb[3].mxu1  ;;  %v1705_v19 = vpop.f32.mrb[3].mxu0  ;;  %v837_v35 = vcombine.high %v643_v11, %v2138_v0  ;;  %v844_v37 = vrot.slane %v643_v11, %v2512_v33  ;;  %v715_v45 = vcombine.high %v580_v17, %v2138_v0  ;;  %v722_v51 = vrot.slane %v580_v17, %v2512_v33 }
 0x1a2   : > { %v851_v41 = vrot.slane %v837_v35, %v2512_v33  ;;  %v729_v58 = vrot.slane %v715_v45, %v2512_v33 }
 0x1a4   : > { %712 = vrot.lane.b32.xlu0 %v580_v17, %s2140_s0 }
 0x1a6   : > { %v705_v21 = vpop.f32.mrb[4].mxu0 }
 0x1a7   : > { %v2505_v22 = vadd.f32 %v1651_v20, %v705_v21  ;;  %v1720_v23 = vpop.f32.mrb[5].mxu0 }
 0x1a8   : > { %v708_v24 = vpop.f32.mrb[6].mxu0 }
 0x1a9   : > { %956 = vrot.lane.b32.xlu0 %v2505_v22, %s2140_s0  ;;  %v1721_v25 = vpop.f32.mrb[7].mxu0  ;;  %v966_v45 = vrot.slane %v2505_v22, %v2512_v33  ;;  %s1674_s0 = sshll.u32 %s2238_s15, 7  ;;  %s2143_s15 = smov [#allocation15]  }
 0x1aa   : > { %s2638_s2 = scalar_lea.hbm %s2729_s1, %s1674_s0 }
 0x212   : > { %v835_v36 = vpop.permute.xlu0 %834 }
 0x213   : > { %v852_v39 = vcombine.high %v835_v36, %v2138_v0  ;;  %v859_v40 = vrot.slane %v835_v36, %v2512_v33 }
 0x215   : > { %v866_v42 = vrot.slane %v852_v39, %v2512_v33  ;;  %v867_v43 = vcombine.low %v844_v37, %v859_v40  ;;  %v868_v44 = vcombine.high %v844_v37, %v859_v40 }
 0x216   : > { %v713_v46 = vpop.permute.xlu0 %712 }
 0x217   : > { %v875_v47 = vrot.slane %v867_v43, %v2517_v38  ;;  %v882_v48 = vrot.slane %v868_v44, %v2517_v38  ;;  %v883_v49 = vcombine.low %v851_v41, %v866_v42  ;;  %v884_v50 = vcombine.high %v851_v41, %v866_v42 }
 0x218   : > { %v730_v52 = vcombine.high %v713_v46, %v2138_v0  ;;  %v737_v53 = vrot.slane %v713_v46, %v2512_v33  ;;  %v959_v43 = vcombine.high %v2505_v22, %v2138_v0 }
 0x219   : > { %v891_v54 = vrot.slane %v883_v49, %v2517_v38  ;;  %v898_v55 = vrot.slane %v884_v50, %v2517_v38  ;;  %v903_v56 = vcombine.low %v875_v47, %v882_v48  ;;  %v1657_v57 = vcombine.high %v875_v47, %v882_v48 }
 0x21a   : > { %v744_v59 = vrot.slane %v730_v52, %v2512_v33  ;;  %v745_v60 = vcombine.low %v722_v51, %v737_v53  ;;  %v746_v61 = vcombine.high %v722_v51, %v737_v53  ;;  %v973_v46 = vrot.slane %v959_v43, %v2512_v33 }
 0x21b   : > { %v910_v62 = vrot.slane %v903_v56, %v2512_v33  ;;  %v918_v63 = vrot.slane %v1657_v57, %v2512_v33  ;;  %v919_v1 = vcombine.low %v891_v54, %v898_v55  ;;  %v1658_v2 = vcombine.high %v891_v54, %v898_v55  ;;  %v957_v44 = vpop.permute.xlu0 %956 }
 0x21c   : > { %v753_v3 = vrot.slane %v745_v60, %v2517_v38  ;;  %v760_v5 = vrot.slane %v746_v61, %v2517_v38  ;;  %v761_v6 = vcombine.low %v729_v58, %v744_v59  ;;  %v762_v7 = vcombine.high %v729_v58, %v744_v59 }
 0x21d   : > { %v926_v8 = vrot.slane %v919_v1, %v2512_v33  ;;  %v934_v9 = vrot.slane %v1658_v2, %v2512_v33  ;;  %v935_v10 = vcombine.low %v910_v62, %v918_v63  ;;  %v974_v47 = vcombine.high %v957_v44, %v2138_v0 }
 0x21e   : > { %v769_v11 = vrot.slane %v761_v6, %v2517_v38  ;;  %v776_v12 = vrot.slane %v762_v7, %v2517_v38  ;;  %v781_v13 = vcombine.low %v753_v3, %v760_v5  ;;  %v1655_v14 = vcombine.high %v753_v3, %v760_v5 }
 0x21f   : > { %v943_v15 = vcombine.low %v926_v8, %v934_v9  ;;  %v942_v20 = vrot.slane %v935_v10, %v2517_v38  ;;  %v981_v48 = vrot.slane %v957_v44, %v2512_v33  ;;  %v988_v49 = vrot.slane %v974_v47, %v2512_v33 }
 0x220   : > { %v788_v16 = vrot.slane %v781_v13, %v2512_v33  ;;  %v796_v17 = vrot.slane %v1655_v14, %v2512_v33  ;;  %v797_v18 = vcombine.low %v769_v11, %v776_v12  ;;  %v1656_v19 = vcombine.high %v769_v11, %v776_v12 }
 0x221   : > { %v950_v21 = vrot.slane %v943_v15, %v2517_v38  ;;  %v989_v50 = vcombine.low %v966_v45, %v981_v48  ;;  %v990_v51 = vcombine.high %v966_v45, %v981_v48  ;;  %v1005_v52 = vcombine.low %v973_v46, %v988_v49 }
 0x222   : > { %v804_v23 = vrot.slane %v797_v18, %v2512_v33  ;;  %v812_v24 = vrot.slane %v1656_v19, %v2512_v33  ;;  %v813_v25 = vcombine.low %v788_v16, %v796_v17  ;;  %v1006_v53 = vcombine.high %v973_v46, %v988_v49 }
 0x223   : > { %v951_v26 = vcombine.low %v942_v20, %v950_v21  ;;  %v952_v27 = vcombine.high %v942_v20, %v950_v21  ;;  %v997_v54 = vrot.slane %v989_v50, %v2517_v38  ;;  %v1004_v55 = vrot.slane %v990_v51, %v2517_v38 }
 0x224   : > { %v821_v29 = vcombine.low %v804_v23, %v812_v24  ;;  %v820_v35 = vrot.slane %v813_v25, %v2517_v38  ;;  %v1013_v56 = vrot.slane %v1005_v52, %v2517_v38  ;;  %v1020_v22 = vrot.slane %v1006_v53, %v2517_v38 }
 0x225   : > { %v953_v31 = vpack.c.bf16 %v951_v26, %v951_v26  ;;  %v954_v32 = vpack.c.bf16 %v952_v27, %v952_v27  ;;  %v1025_v57 = vcombine.low %v997_v54, %v1004_v55  ;;  %v1659_v58 = vcombine.high %v997_v54, %v1004_v55 }
 0x226   : > { %v828_v34 = vrot.slane %v821_v29, %v2517_v38  ;;  %v1041_v59 = vcombine.low %v1013_v56, %v1020_v22  ;;  %v1660_v60 = vcombine.high %v1013_v56, %v1020_v22  ;;  %v1202_v25 = vand.u32 127, %v719_v28 }
 0x227   : > { %v1089_v36 = vsel %vm1084_vm2, %v953_v31, 0  ;;  %v1135_v37 = vsel %vm1084_vm2, %v954_v32, 0  ;;  %v1032_v61 = vrot.slane %v1025_v57, %v2512_v33  ;;  %v1040_v62 = vrot.slane %v1659_v58, %v2512_v33 }
 0x228   : > { %1723 = vmatpush3.bf16.xpose.msra.mxu1 %v1089_v36  ;;  %1729 = vmatpush3.bf16.xpose.msra.mxu0 %v1135_v37  ;;  %v829_v39 = vcombine.low %v820_v35, %v828_v34  ;;  %v830_v40 = vcombine.high %v820_v35, %v828_v34  ;;  %v1048_v63 = vrot.slane %v1041_v59, %v2512_v33  ;;  %v1204_v26 = vmul.u32 2246822507, %v2509_v30 }
 0x229   : > { %1734 = vmatprep.subr.bf16.mxu1 %v2138_v0  ;;  %1740 = vmatprep.subr.bf16.mxu0 %v2138_v0  ;;  %v1056_v1 = vrot.slane %v1660_v60, %v2512_v33  ;;  %v1057_v2 = vcombine.low %v1032_v61, %v1040_v62  ;;  %v1661_v33 = vld [vmem:[%s511_s21] ss:$0 sm:$0xff]  ;;  %v1200_v27 = vadd.s32 8, %v2509_v30  ;;  %v1206_v29 = vstv %s1203_s16  ;;  %v1869_v62 = vld [vmem:[%s2692_s9 + $0x8] sm:$0xff]   ;;  %s2726_s21 = sld [smem:[#allocation23_spill]]  ;;  %s2727_s16 = sld [smem:[#allocation24_spill]] }
 0x22a   : > { %v831_v41 = vpack.c.bf16 %v829_v39, %v829_v39  ;;  %v832_v42 = vpack.c.bf16 %v830_v40, %v830_v40  ;;  %v1207_v31 = vxor.u32 %v1206_v29, %v1204_v26  ;;  %v2595_v32 = vmul.u32 3266489909, %v1202_v25  ;;  %v1868_v61 = vld [vmem:[%s2692_s9] sm:$0xff]  }
 0x22b   : > { %v1065_v3 = vcombine.low %v1048_v63, %v1056_v1  ;;  %v1064_v5 = vrot.slane %v1057_v2, %v2517_v38  ;;  %v1205_v34 = vmul.u32 2246822507, %v1200_v27 }
 0x22c   : > { %v1210_v35 = vxor.u32 %v2595_v32, %v1207_v31 }
 0x22d   : > { %v1072_v6 = vrot.slane %v1065_v3, %v2517_v38  ;;  %v1208_v36 = vxor.u32 %v1206_v29, %v1205_v34 }
 0x22e   : > { %v1212_v37 = vshrl.u32 %v1210_v35, 15 }
 0x22f   : > { %1725 = vmatmul.mubr.msk.bf16.vlgmr.msra.gmra.mrb[4].mxu1 %vm1084_vm2, %v831_v41  ;;  %1731 = vmatmul.mubr.msk.bf16.vlgmr.msra.gmra.mrb[8].mxu0 %vm1084_vm2, %v832_v42  ;;  %v1073_v7 = vcombine.low %v1064_v5, %v1072_v6  ;;  %v1074_v8 = vcombine.high %v1064_v5, %v1072_v6  ;;  %v1211_v39 = vxor.u32 %v2595_v32, %v1208_v36  ;;  %v1670_v30 = vld [vmem:[%s2726_s21] ss:$0 sm:$0xff] }
 0x230   : > { %1736 = vmatprep.mubr.msk.bf16.mxu1 %vm2139_vm0, %v2138_v0  ;;  %1742 = vmatprep.mubr.msk.bf16.mxu0 %vm2139_vm0, %v2138_v0  ;;  %v1214_v40 = vxor.u32 %v1212_v37, %v1210_v35 }
 0x231   : > { %v1075_v9 = vpack.c.bf16 %v1073_v7, %v1073_v7  ;;  %v1076_v10 = vpack.c.bf16 %v1074_v8, %v1074_v8  ;;  %v1213_v41 = vshrl.u32 %v1211_v39, 15 }
 0x232   : > { %v1216_v43 = vmul.u32 2146121005, %v1214_v40 }
 0x233   : > { %v1235_v11 = vsel %vm1233_vm3, %v1075_v9, 0  ;;  %v1281_v12 = vsel %vm1233_vm3, %v1076_v10, 0  ;;  %v1215_v44 = vxor.u32 %v1213_v41, %v1211_v39  ;;  %v517_v41 = vunpack.c.l.bf16 %v2487_v4 }
 0x234   : > { %1735 = vmatpush3.bf16.msra.mxu1 %v1235_v11  ;;  %1741 = vmatpush3.bf16.msra.mxu0 %v1281_v12  ;;  %v1218_v48 = vshrl.u32 %v1216_v43, 16 }
 0x235   : > { %1746 = vmatprep.subr.bf16.mxu1 %v2138_v0  ;;  %1752 = vmatprep.subr.bf16.mxu0 %v2138_v0  ;;  %v1217_v49 = vmul.u32 2146121005, %v1215_v44 }
 0x236   : > { %v1220_v51 = vxor.u32 %v1218_v48, %v1216_v43 }
 0x237   : > { %v1219_v52 = vshrl.u32 %v1217_v49, 16 }
 0x238   : > { %vm1222_vm5 = vcmp.ge.u32.totalorder %v1220_v51, 429496729 }
 0x239   : > { %v1221_v53 = vxor.u32 %v1219_v52, %v1217_v49 }
 0x23b   : > { %vm1223_vm6 = vcmp.ge.u32.totalorder %v1221_v53, 429496729  ;;  %v1671_v53 = vld [vmem:[%s2727_s16] ss:$0 sm:$0xff] }
 0x302   : > { %v1125_v38 = vpop.f32.mrb[4].mxu1  ;;  %v1171_v13 = vpop.f32.mrb[8].mxu0 }
 0x303   : > { %v1126_v14 = vadd.f32 %v1661_v33, %v1125_v38  ;;  %v1726_v15 = vpop.f32.mrb[5].mxu1  ;;  %v1732_v16 = vpop.f32.mrb[9].mxu0  ;;  %v1172_v19 = vadd.f32 %v1661_v33, %v1171_v13 }
 0x304   : > { %v1128_v17 = vpop.f32.mrb[6].mxu1  ;;  %v1174_v18 = vpop.f32.mrb[10].mxu0  ;;  %v1441_v16 = vstv %s1440_s23  ;;  %s508_s23 = scalar_lea.vmem [#allocation15], %s1642_s10  ;;  %s2054_s10 = sshll.u32 %s2143_s15, 4  ;;  %s2055_s10 = int_to_ptr.vmem [resolvable:$false] %s2054_s10 }
 0x305   : > { %v1727_v20 = vpop.f32.mrb[7].mxu1  ;;  %v1733_v21 = vpop.f32.mrb[11].mxu0  ;;  %v1178_v23 = vsel %vm1177_vm4, %v1126_v14, -inf  ;;  %v1181_v24 = vsel %vm1177_vm4, %v1172_v19, -inf  ;;  %v1442_v17 = vxor.u32 %v1441_v16, %v1204_v26  ;;  %s1498_s12 = sshll.u32 %s508_s23, 4  ;;  %s2056_s16 = scalar_lea.vmem %s2055_s10, 256  ;;  %s2640_s12 = int_to_ptr.vmem [resolvable:$true] %s1498_s12 }
 0x306   : > { %1179 = vmax.xlane.f32.xlu1 %v1178_v23  ;;  %s2050_s22 = scalar_lea.vmem %s2640_s12, 128  ;;  %p2057_p0 = scmp.lt.s32.totalorder %s2640_s12, %s2055_s10 }
 0x307   : > { %v1443_v18 = vxor.u32 %v1442_v17, %v2595_v32  ;;  %p2051_p4 = scmp.ne.s32.totalorder %s2640_s12, %s2050_s22  ;;  %p2058_p2 = scmp.lt.s32.totalorder %s2056_s16, %s2050_s22 }
 0x309   : > { %p2052_p1 = pnand %p2051_p4, %p2730_p12  ;;  %p2059_p3 = por %p2058_p2, %p2057_p0 }
 0x30a   : > { %1182 = vmax.xlane.f32.xlu1 %v1181_v24 }
 0x30b   : > { %p2053_p13 = pneg %p2052_p1 }
 0x30d   : > { %p2060_p6 = pnand %p2059_p3, %p2053_p13 }
 0x393   : > { %v1180_v28 = vpop.xlane.xlu1 %1179 }
 0x394   : > { %v1184_v42 = vsub.f32 %v1126_v14, %v1180_v28 }
 0x396   : > { %v1186_v45 = vmul.f32 1.442695, %v1184_v42 }
 0x397   : > { %v1183_v46 = vpop.xlane.xlu1 %1182 }
 0x398   : > { %1870 = vpow2.f32 %v1186_v45  ;;  %v1185_v47 = vsub.f32 %v1172_v19, %v1183_v46  ;;  %v1444_v19 = vshrl.u32 %v1443_v18, 15 }
 0x39a   : > { %v1188_v50 = vmul.f32 1.442695, %v1185_v47  ;;  %v1445_v20 = vxor.u32 %v1444_v19, %v1443_v18 }
 0x39c   : > { %1872 = vpow2.f32 %v1188_v50  ;;  %v1446_v21 = vmul.u32 2146121005, %v1445_v20 }
 0x39e   : > { %v1447_v25 = vshrl.u32 %v1446_v21, 16 }
 0x3a0   : > { %v1448_v36 = vxor.u32 %v1447_v25, %v1446_v21 }
 0x3a2   : > { %v1871_v54 = vpop.eup %1870  ;;  %vm1449_vm7 = vcmp.ge.u32.totalorder %v1448_v36, 429496729 }
 0x3a3   : > { %v1190_v55 = vsel %vm1177_vm4, %v1871_v54, 0.0  ;;  %v1224_v56 = vsel %vm1222_vm5, %v1871_v54, 0.0 }
 0x3a4   : > { %1191 = vadd.xlane.f32.xlu1 %v1190_v55  ;;  %v1228_v22 = vpack.c.bf16 %v1224_v56, %v1224_v56  ;;  %v1672_v55 = vld [vmem:[%s2728_s11] ss:$0 sm:$0xff] }
 0x3a6   : > { %v1873_v57 = vpop.eup %1872  ;;  %1737 = vmatmul.mubr.msk.bf16.vlgmr.msra.gmra.mrb[8].mxu1 %vm1177_vm4, %v1228_v22 }
 0x3a7   : > { %v1193_v58 = vsel %vm1177_vm4, %v1873_v57, 0.0  ;;  %v1225_v59 = vsel %vm1223_vm6, %v1873_v57, 0.0  ;;  %1748 = vmatprep.mubr.msk.bf16.mxu1 %vm2139_vm0, %v2138_v0  ;;  %1747 = vmatpush3.bf16.msra.mxu1 %v1868_v61 }
 0x3a8   : > { %1194 = vadd.xlane.f32.xlu0 %v1193_v58  ;;  %v1229_v60 = vpack.c.bf16 %v1225_v59, %v1225_v59 }
 0x3aa   : > { %1743 = vmatmul.mubr.msk.bf16.vlgmr.msra.gmra.mrb[12].mxu0 %vm1177_vm4, %v1229_v60 }
 0x3ab   : > { %1754 = vmatprep.mubr.msk.bf16.mxu0 %vm2139_vm0, %v2138_v0  ;;  %1753 = vmatpush3.bf16.msra.mxu0 %v1869_v62 }
 0x431   : > { %v1192_v63 = vpop.xlane.xlu1 %1191 }
 0x432   : > { %1874 = vrcp.f32 %v1192_v63 }
 0x435   : > { %v1195_v1 = vpop.xlane.xlu0 %1194 }
 0x436   : > { %1876 = vrcp.f32 %v1195_v1 }
 0x43c   : > { %v1875_v2 = vpop.eup %1874 }
 0x43d   : > { %v1226_v3 = vmul.f32 1.1111112, %v1875_v2 }
 0x440   : > { %v1877_v5 = vpop.eup %1876 }
 0x441   : > { %v1227_v11 = vmul.f32 1.1111112, %v1877_v5 }
 0x479   : > { %v1271_v6 = vpop.f32.mrb[8].mxu1 }
 0x47a   : > { %v1323_v0 = vmul.f32 %v1271_v6, %v1226_v3  ;;  %v1738_v7 = vpop.f32.mrb[9].mxu1 }
 0x47b   : > { %v1274_v8 = vpop.f32.mrb[10].mxu1 }
 0x47c   : > { %v1325_v9 = vpack.c.bf16 %v1323_v0, %v1323_v0  ;;  %v1739_v10 = vpop.f32.mrb[11].mxu1 }
 0x47d   : > { %v1317_v12 = vpop.f32.mrb[12].mxu0 }
 0x47e   : > { %v1324_v33 = vmul.f32 %v1317_v12, %v1227_v11  ;;  %v1744_v38 = vpop.f32.mrb[13].mxu0  ;;  %1749 = vmatmul.mubr.msk.bf16.vlgmr.msra.gmra.mrb[12].mxu1 %vm1084_vm2, %v1325_v9 }
 0x47f   : > { %v1320_v13 = vpop.f32.mrb[14].mxu0 }
 0x480   : > { %v1326_v14 = vpack.c.bf16 %v1324_v33, %v1324_v33  ;;  %v1745_v15 = vpop.f32.mrb[15].mxu0 }
 0x482   : > { %1755 = vmatmul.mubr.msk.bf16.vlgmr.msra.gmra.mrb[16].mxu0 %vm1084_vm2, %v1326_v14 }
 0x551   : > { %v1374_v23 = vpop.f32.mrb[12].mxu1 }
 0x552   : > { %v1750_v24 = vpop.f32.mrb[13].mxu1  ;;  %v1429_v34 = vsel %vm541_vm1, %v1374_v23, 0.0 }
 0x553   : > { %v1377_v27 = vpop.f32.mrb[14].mxu1 }
 0x554   : > { %v1751_v29 = vpop.f32.mrb[15].mxu1 }
 0x555   : > { %v1423_v31 = vpop.f32.mrb[16].mxu0 }
 0x556   : > { %v1430_v35 = vsel %vm541_vm1, %v1423_v31, 0.0  ;;  %v1756_v26 = vpop.f32.mrb[17].mxu0 }
 0x557   : > { %v1431_v32 = vadd.f32 %v1430_v35, %v1429_v34  ;;  %v1426_v37 = vpop.f32.mrb[18].mxu0 }
 0x558   : > { %v1757_v39 = vpop.f32.mrb[19].mxu0 }
 0x559   : > { %v1439_v40 = vadd.f32 %v1670_v30, %v1431_v32 }
 0x55b   : > { %v1450_v28 = vmul.f32 1.1111112, %v1439_v40 }
 0x55d   : > { %v1451_v42 = vsel %vm1449_vm7, %v1450_v28, 0.0 }
 0x55e   : > { %v1452_v43 = vadd.f32 %v1451_v42, %v517_v41 }
 0x560   : > { %v1453_v44 = vsel %vm541_vm1, %v1452_v43, 0.0 }
 0x561   : > { %1454 = vadd.xlane.f32.xlu1 %v1453_v44 }
 0x5ee   : > { %v1455_v45 = vpop.xlane.xlu1 %1454 }
 0x5ef   : > { %v1457_v46 = vmul.f32 0.03125, %v1455_v45 }
 0x5f1   : > { %v1458_v47 = vsub.f32 %v1452_v43, %v1457_v46 }
 0x5f3   : > { %v1459_v48 = vmul.f32 %v1458_v47, %v1458_v47 }
 0x5f5   : > { %v1460_v49 = vsel %vm541_vm1, %v1459_v48, 0.0 }
 0x5f6   : > { %1461 = vadd.xlane.f32.xlu1 %v1460_v49 }
 0x683   : > { %v1462_v50 = vpop.xlane.xlu1 %1461 }
 0x684   : > { %v1463_v51 = vmul.f32 0.03125, %v1462_v50 }
 0x686   : > { %v1464_v4 = vadd.f32 1e-12, %v1463_v51 }
 0x688   : > { %1878 = vrsqrt.f32 %v1464_v4 }
 0x692   : > { %v1879_v52 = vpop.eup %1878 }
 0x693   : > { %v1466_v54 = vmul.f32 %v1879_v52, %v1458_v47 }
 0x695   : > { %v1474_v56 = vmul.f32 %v1671_v53, %v1466_v54 }
 0x697   : > { %v1482_v22 = vadd.f32 %v1672_v55, %v1474_v56 }
 0x699   : > { %1483 = vst.msk [vmem:[%s508_s23] sm:$0xff] %vm541_vm1, %v1482_v22 }
 0x69a   : > { %2063 = shalt.err (!%p2060_p6)
}
 0x69b   : > { %s2064_s13 = scalar_lea.hbm %s2638_s2, 128  ;;  %s2068_s11 = scalar_lea.hbm %s2729_s1, 256 }
 0x69c   : > { %p2065_p10 = scmp.ne.s32.totalorder %s2638_s2, %s2064_s13  ;;  %p2069_p5 = scmp.lt.u32.totalorder %s2638_s2, %s2729_s1 }
 0x69d   : > { %p2070_p9 = scmp.lt.u32.totalorder %s2068_s11, %s2064_s13  ;;  %p2072_p4 = scmp.lt.u32.totalorder %s2064_s13, %s2638_s2 }
 0x69e   : > { %p2066_p11 = pnand %p2065_p10, %p2730_p12 }
 0x69f   : > { %p2071_p7 = por %p2070_p9, %p2069_p5 }
 0x6a0   : > { %p2067_p8 = pneg %p2066_p11 }
 0x6a1   : > { %p2073_p1 = por %p2072_p4, %p2071_p7 }
 0x6a3   : > { %p2074_p13 = pnand %p2073_p1, %p2067_p8 }
 0x6a5   : > { %2077 = shalt.err (!%p2074_p13)
}
 0x6a6   : > { %1780 = dma.vmem_to_hbm [thread:$0]  (%p2730_p12), %s2640_s12, 128, %s2638_s2, %s1485_s25  }
 0x6a7 PF: > { %s1510_s18 = sand.u32 1, %s2116_s27   ;;  %p2731_p0 = scmp.ne.s32.totalorder %s2715_s14, 0 }
 0x6a8   : > { %p2732_p2 = scmp.ge.s32.totalorder %s2128_s30, 2  ;;  %s1511_s21 = scalar_lea.sflag [#allocation6], %s1510_s18 }
 0x6aa   : > { %p1803_p3 = pnand %p2732_p2, %p2731_p0 }
 0x6ac   : > { %2111 = dma.done.wait (!%p1803_p3), %s1511_s21, 128  }
 0x6ad   : > { %2113 = vsyncadd (!%p1803_p3), %s1511_s21, 4294967168  ;;  %p30_p6 = scmp.ge.s32.totalorder %s2383_s19, 4   ;;  %s2733_s27 = smov %s2120_s28 }
 0x6ae   : > { %s2734_s28 = smov %s2124_s29  ;;  %s2735_s29 = smov %s2395_s26 }
 0x6af   : > { %s2736_s30 = smov %s2383_s19  ;;  %32 = sbr.rel (!%p30_p6) target bundleno = 16 (0x10), region = 136 }
 0x6b6   :  { %1516 = vsyncpa [#allocation5], 1 }
 0x6b7   :  { %1518 = vsyncpa [#allocation5 + $0x1], 1 }
 0x6b8   :  { %1519 = vsyncpa [#allocation8], 1 }
 0x6b9   :  { %1520 = vsyncpa [#allocation11], 1 }
 0x6ba   :  { %1521 = vsyncpa [#allocation14], 1 }
 0x6bb   :  { %1522 = vsyncpa [#allocation6], 1 }
 0x6bc   :  { %1524 = vsyncpa [#allocation6 + $0x1], 1 }

</bundles_post_ra>
